<compile_context>
chip_gen: v5e
topology: v5e:2x2
jax: 0.10.0
libtpu: 0.0.40
codegen_flags: <defaults>
</compile_context>

<pallas_src>
import functools

import jax
import jax.numpy as jnp
from jax import lax
from jax.experimental import pallas as pl
from jax.experimental.pallas import tpu as pltpu

# ---------------------------------------------------------------------------
# Model hyper-parameters (small, synthetic).
# ---------------------------------------------------------------------------
VOCAB = 16          # vmap.size
EMB = 16            # ALBERT factorized embedding size
HIDDEN = 32         # self.bert.hidden
NUM_HEADS = 4
HEAD_DIM = HIDDEN // NUM_HEADS
FFN = 64
N_LAYERS = 2        # ALBERT: same layer parameters reused N_LAYERS times
BATCH = 2
SEQ = 8
LN_EPS = 1e-12
OUT_PAD = 128       # lane-dense output width (multiple of 128)

# --- bf16 weight-slab row offsets (all multiples of the bf16 sublane tile 16)
W_R_PROJ = 0                       # proj_w   (EMB, HIDDEN)        rows 0:16
W_R_ATTN = 16                      # [wqkv | wo]  (HIDDEN, 128)    rows 16:48
W_R_W1 = 48                        # w1       (HIDDEN, FFN)        rows 48:80
W_R_W2 = 80                        # w2       (FFN, HIDDEN)        rows 80:144
W_R_HEAD = 144                     # mlm head (HIDDEN, 128)        rows 144:176
W_ROWS = 176

# --- f32 vector-slab row offsets
V_R_EMB_LN_G, V_R_EMB_LN_B = 0, 1
V_R_PROJ_B = 2
V_R_BQKV = 3
V_R_BO = 4
V_R_LN1_G, V_R_LN1_B = 5, 6
V_R_B1, V_R_B2 = 7, 8
V_R_LN2_G, V_R_LN2_B = 9, 10
V_R_HEAD_B = 11
V_R_TOK = 16                       # tok_emb table  rows 16:32
V_R_POS = 32                       # pos_emb tiled  rows 32:32+B*S

_VMEM = pl.BlockSpec(memory_space=pltpu.MemorySpace.VMEM)


def _layer_norm(x, g, b):
    mu = jnp.mean(x, axis=-1, keepdims=True)
    var = jnp.mean((x - mu) ** 2, axis=-1, keepdims=True)
    return (x - mu) * lax.rsqrt(var + LN_EPS) * g + b


# ---------------------------------------------------------------------------
# Fused BBERT forward kernel.
#   tokens (B*S, 1) int32  -> embedding gather + LN + E->H projection
#   -> N_LAYERS shared ALBERT layers (unrolled, shared weights stay in vregs)
#   -> one (B*S, 128) output: lanes 0:32 hidden, lanes 32:47 MLM logits.
# ---------------------------------------------------------------------------
def _bbert_fused_kernel(tok_ref, w_ref, vec_ref, out_ref, *, batch, seq):
    f32, bf16 = jnp.float32, jnp.bfloat16
    m = batch * seq
    H, D, NH = HIDDEN, HEAD_DIM, NUM_HEADS

    # ---- weights (bf16), loaded once, resident across the unrolled layers.
    proj_w = w_ref[W_R_PROJ:W_R_PROJ + EMB, 0:H]            # (16, 32)
    attn_w = w_ref[W_R_ATTN:W_R_ATTN + H, :]                # (32, 128)
    wqkv = attn_w[:, 0:3 * H]                               # (32, 96)
    wo = attn_w[:, 3 * H:4 * H]                             # (32, 32)
    w1 = w_ref[W_R_W1:W_R_W1 + H, 0:FFN]                    # (32, 64)
    w2 = w_ref[W_R_W2:W_R_W2 + FFN, 0:H]                    # (64, 32)
    head_w = w_ref[W_R_HEAD:W_R_HEAD + H, :]                # (32, 128)

    # ---- f32 vectors / tables, loaded + broadcast ONCE (hoisted above the
    #      layer loop; JAX does not CSE broadcast_in_dim).
    def row(i, width):
        return vec_ref[i:i + 1, 0:width]                    # (1, width)

    emb_ln_g = row(V_R_EMB_LN_G, EMB)
    emb_ln_b = row(V_R_EMB_LN_B, EMB)
    proj_b = jnp.broadcast_to(row(V_R_PROJ_B, H), (m, H))
    bqkv = jnp.broadcast_to(row(V_R_BQKV, 3 * H), (m, 3 * H))
    bo = jnp.broadcast_to(row(V_R_BO, H), (m, H))
    ln1_g = jnp.broadcast_to(row(V_R_LN1_G, H), (m, H))
    ln1_b = jnp.broadcast_to(row(V_R_LN1_B, H), (m, H))
    b1 = jnp.broadcast_to(row(V_R_B1, FFN), (m, FFN))
    b2 = jnp.broadcast_to(row(V_R_B2, H), (m, H))
    ln2_g = jnp.broadcast_to(row(V_R_LN2_G, H), (m, H))
    ln2_b = jnp.broadcast_to(row(V_R_LN2_B, H), (m, H))
    head_b = jnp.broadcast_to(vec_ref[V_R_HEAD_B:V_R_HEAD_B + 1, :], (m, OUT_PAD))
    tok_tab = vec_ref[V_R_TOK:V_R_TOK + VOCAB, 0:EMB]       # (16, 16) f32
    pos = vec_ref[V_R_POS:V_R_POS + m, 0:EMB]               # (m, 16) f32

    # ---- embedding: exact gather via one-hot @ tok_emb on the MXU.
    # TODO(synk): token-type embeddings / attention mask / dropout omitted
    # (eval-mode, single segment, unmasked).
    tok_ids = tok_ref[...]                                  # (m, 1) int32
    eq = tok_ids == lax.broadcasted_iota(jnp.int32, (m, VOCAB), 1)
    onehot = jnp.where(eq, jnp.float32(1.0), jnp.float32(0.0))
    emb = jnp.dot(onehot, tok_tab, preferred_element_type=f32) + pos
    emb = _layer_norm(emb, emb_ln_g, emb_ln_b)
    # Factorized embedding projection E -> H.
    x = jnp.dot(emb.astype(bf16), proj_w, preferred_element_type=f32) + proj_b

    # ---- ALBERT: the SAME layer parameters applied N_LAYERS times.
    # (1/sqrt(HEAD_DIM) is pre-folded into wq / bq.)
    for _ in range(N_LAYERS):
        # Fused Q/K/V projection: one MXU op instead of three.
        qkv = (jnp.dot(x.astype(bf16), wqkv, preferred_element_type=f32)
               + bqkv).astype(bf16)                         # (m, 96)
        qkv3 = qkv.reshape(batch, seq, 3 * H)               # (B, S, 96)

        # Heads folded into the batch axis of the batched einsums:
        # leading-axis stack of tiny lane slices -> (NH*B, S, D).
        q_bh = jnp.concatenate(
            [qkv3[:, :, h * D:(h + 1) * D] for h in range(NH)], axis=0)
        k_bh = jnp.concatenate(
            [qkv3[:, :, H + h * D:H + (h + 1) * D] for h in range(NH)], axis=0)
        v_bh = jnp.concatenate(
            [qkv3[:, :, 2 * H + h * D:2 * H + (h + 1) * D] for h in range(NH)],
            axis=0)

        # Two batched einsums for ALL heads (scale already folded into wq).
        s = jnp.einsum('bqd,bkd->bqk', q_bh, k_bh,
                       preferred_element_type=f32)           # (NH*B, S, S)
        s = s - jnp.max(s, axis=-1, keepdims=True)
        p = jnp.exp(s)
        p = p * pl.reciprocal(jnp.sum(p, axis=-1, keepdims=True), approx=True)
        ctx_bh = jnp.einsum('bqk,bkd->bqd', p.astype(bf16), v_bh,
                            preferred_element_type=f32)      # (NH*B, S, D)

        # Back to (m, HIDDEN) with heads along lanes (same order as wo rows).
        ctx = jnp.concatenate(
            [ctx_bh[h * batch:(h + 1) * batch] for h in range(NH)], axis=-1)
        ctx = ctx.reshape(m, H)

        attn = jnp.dot(ctx.astype(bf16), wo, preferred_element_type=f32) + bo
        h1 = _layer_norm(x + attn, ln1_g, ln1_b)

        ff = jnp.dot(h1.astype(bf16), w1, preferred_element_type=f32) + b1
        # TODO(synk): tanh GELU (EUP); PyTorch nn.GELU default is exact erf.
        ff = jax.nn.gelu(ff, approximate=True)
        ff = jnp.dot(ff.astype(bf16), w2, preferred_element_type=f32) + b2
        x = _layer_norm(h1 + ff, ln2_g, ln2_b)

    # ---- fused output: one lane-dense 128-wide buffer.
    #   head_w / head_b are zero outside lanes 32:47, so the full-width store
    #   leaves lanes 0:32 zero; they are then overwritten with the hidden state.
    out_ref[...] = (jnp.dot(x.astype(bf16), head_w, preferred_element_type=f32)
                    + head_b)
    out_ref[:, 0:H] = x


# ---------------------------------------------------------------------------
# Parameter init (deterministic, synthetic) — plain f32 "torch-like" params.
# ---------------------------------------------------------------------------
def init_params(key):
    ks = jax.random.split(key, 12)
    std = 0.02
    return {
        "tok_emb": jax.random.normal(ks[0], (VOCAB, EMB), jnp.float32) * std,
        "pos_emb": jax.random.normal(ks[1], (SEQ, EMB), jnp.float32) * std,
        "emb_ln_g": jnp.ones((EMB,), jnp.float32),
        "emb_ln_b": jnp.zeros((EMB,), jnp.float32),
        "emb_proj_w": jax.random.normal(ks[2], (EMB, HIDDEN), jnp.float32) * std,
        "emb_proj_b": jnp.zeros((HIDDEN,), jnp.float32),
        "wq": jax.random.normal(ks[3], (HIDDEN, HIDDEN), jnp.float32) * std,
        "wk": jax.random.normal(ks[4], (HIDDEN, HIDDEN), jnp.float32) * std,
        "wv": jax.random.normal(ks[5], (HIDDEN, HIDDEN), jnp.float32) * std,
        "wo": jax.random.normal(ks[6], (HIDDEN, HIDDEN), jnp.float32) * std,
        "bq": jnp.zeros((HIDDEN,), jnp.float32),
        "bk": jnp.zeros((HIDDEN,), jnp.float32),
        "bv": jnp.zeros((HIDDEN,), jnp.float32),
        "bo": jnp.zeros((HIDDEN,), jnp.float32),
        "ln1_g": jnp.ones((HIDDEN,), jnp.float32),
        "ln1_b": jnp.zeros((HIDDEN,), jnp.float32),
        "w1": jax.random.normal(ks[7], (HIDDEN, FFN), jnp.float32) * std,
        "b1": jnp.zeros((FFN,), jnp.float32),
        "w2": jax.random.normal(ks[8], (FFN, HIDDEN), jnp.float32) * std,
        "b2": jnp.zeros((HIDDEN,), jnp.float32),
        "ln2_g": jnp.ones((HIDDEN,), jnp.float32),
        "ln2_b": jnp.zeros((HIDDEN,), jnp.float32),
        "mlm_w": jax.random.normal(ks[9], (HIDDEN, VOCAB - 1), jnp.float32) * std,
        "mlm_b": jnp.zeros((VOCAB - 1,), jnp.float32),
    }


# ---------------------------------------------------------------------------
# One-time device-param packing (runs ONCE, outside jit):
#   * fold 1/sqrt(HEAD_DIM) into wq / bq,
#   * fuse wq|wk|wv (and bq|bk|bv),
#   * pre-cast all weights to bf16, pre-pad the MLM head to 128 lanes,
#   * pack everything into 2 lane-dense slabs (bf16 weights, f32 vectors).
# ---------------------------------------------------------------------------
def prepare_device_params(params, batch, seq):
    scale = 1.0 / (HEAD_DIM ** 0.5)
    wqkv = jnp.concatenate(
        [params["wq"] * scale, params["wk"], params["wv"]], axis=1)   # (32, 96)
    bqkv = jnp.concatenate(
        [params["bq"] * scale, params["bk"], params["bv"]])           # (96,)

    w = jnp.zeros((W_ROWS, 128), jnp.float32)
    w = w.at[W_R_PROJ:W_R_PROJ + EMB, 0:HIDDEN].set(params["emb_proj_w"])
    w = w.at[W_R_ATTN:W_R_ATTN + HIDDEN, 0:3 * HIDDEN].set(wqkv)
    w = w.at[W_R_ATTN:W_R_ATTN + HIDDEN, 3 * HIDDEN:4 * HIDDEN].set(params["wo"])
    w = w.at[W_R_W1:W_R_W1 + HIDDEN, 0:FFN].set(params["w1"])
    w = w.at[W_R_W2:W_R_W2 + FFN, 0:HIDDEN].set(params["w2"])
    # MLM head placed directly at its output lane position (32:47).
    w = w.at[W_R_HEAD:W_R_HEAD + HIDDEN,
             HIDDEN:HIDDEN + VOCAB - 1].set(params["mlm_w"])
    w_slab = w.astype(jnp.bfloat16)

    m = batch * seq
    vec_rows = ((V_R_POS + m + 7) // 8) * 8
    v = jnp.zeros((vec_rows, 128), jnp.float32)
    v = v.at[V_R_EMB_LN_G, 0:EMB].set(params["emb_ln_g"])
    v = v.at[V_R_EMB_LN_B, 0:EMB].set(params["emb_ln_b"])
    v = v.at[V_R_PROJ_B, 0:HIDDEN].set(params["emb_proj_b"])
    v = v.at[V_R_BQKV, 0:3 * HIDDEN].set(bqkv)
    v = v.at[V_R_BO, 0:HIDDEN].set(params["bo"])
    v = v.at[V_R_LN1_G, 0:HIDDEN].set(params["ln1_g"])
    v = v.at[V_R_LN1_B, 0:HIDDEN].set(params["ln1_b"])
    v = v.at[V_R_B1, 0:FFN].set(params["b1"])
    v = v.at[V_R_B2, 0:HIDDEN].set(params["b2"])
    v = v.at[V_R_LN2_G, 0:HIDDEN].set(params["ln2_g"])
    v = v.at[V_R_LN2_B, 0:HIDDEN].set(params["ln2_b"])
    v = v.at[V_R_HEAD_B, HIDDEN:HIDDEN + VOCAB - 1].set(params["mlm_b"])
    v = v.at[V_R_TOK:V_R_TOK + VOCAB, 0:EMB].set(params["tok_emb"])
    pos_tiled = jnp.tile(params["pos_emb"][:seq], (batch, 1))          # (m, EMB)
    v = v.at[V_R_POS:V_R_POS + m, 0:EMB].set(pos_tiled)
    return w_slab, v


# ---------------------------------------------------------------------------
# BBERT forward:  tokens -> (encoder_hidden, mlm_logits)  — single launch.
# ---------------------------------------------------------------------------
@jax.jit
def bbert_forward(tokens, w_slab, vec_slab):
    b, s = tokens.shape
    m = b * s

    out = pl.pallas_call(
        functools.partial(_bbert_fused_kernel, batch=b, seq=s),
        out_shape=jax.ShapeDtypeStruct((m, OUT_PAD), jnp.float32),
        in_specs=[_VMEM, _VMEM, _VMEM],
        out_specs=_VMEM,
    )(tokens.reshape(m, 1), w_slab, vec_slab)

    hidden = out[:, :HIDDEN].reshape(b, s, HIDDEN)
    logits = out[:, HIDDEN:HIDDEN + VOCAB - 1].reshape(b, s, VOCAB - 1)
    return hidden, logits


if __name__ == "__main__":
    key = jax.random.PRNGKey(0)
    pkey, xkey = jax.random.split(key)
    params = init_params(pkey)
    w_slab, vec_slab = prepare_device_params(params, BATCH, SEQ)
    tokens = jax.random.randint(xkey, (BATCH, SEQ), 0, VOCAB, dtype=jnp.int32)

    hidden, mlm_logits = bbert_forward(tokens, w_slab, vec_slab)
    jax.block_until_ready((hidden, mlm_logits))

    assert hidden.shape == (BATCH, SEQ, HIDDEN)
    assert mlm_logits.shape == (BATCH, SEQ, VOCAB - 1)
    assert bool(jnp.all(jnp.isfinite(hidden)))
    assert bool(jnp.all(jnp.isfinite(mlm_logits)))
    print("KERNEL_OK")
</pallas_src>

<mosaic_0001>
module attributes {stable_mosaic.version = 11 : i64} {
  func.func @_bbert_fused_kernel(%arg0: memref<16x1xi32, #tpu.memory_space<vmem>>, %arg1: memref<176x128xbf16, #tpu.memory_space<vmem>>, %arg2: memref<48x128xf32, #tpu.memory_space<vmem>>, %arg3: memref<16x128xf32, #tpu.memory_space<vmem>>) attributes {dimension_semantics = [], scalar_prefetch = 0 : i64, scratch_operands = 0 : i64, tpu.core_type = #tpu.core_type<tc>} {
    %c0 = arith.constant 0 : index
    %c0_0 = arith.constant 0 : index
    %0 = vector.load %arg1[%c0, %c0_0] : memref<176x128xbf16, #tpu.memory_space<vmem>>, vector<16x32xbf16>
    %c16 = arith.constant 16 : index
    %c0_1 = arith.constant 0 : index
    %1 = vector.load %arg1[%c16, %c0_1] : memref<176x128xbf16, #tpu.memory_space<vmem>>, vector<32x128xbf16>
    %2 = vector.extract_strided_slice %1 {offsets = [0, 0], sizes = [32, 96], strides = [1, 1]} : vector<32x128xbf16> to vector<32x96xbf16>
    %3 = vector.extract_strided_slice %1 {offsets = [0, 96], sizes = [32, 32], strides = [1, 1]} : vector<32x128xbf16> to vector<32x32xbf16>
    %c48 = arith.constant 48 : index
    %c0_2 = arith.constant 0 : index
    %4 = vector.load %arg1[%c48, %c0_2] : memref<176x128xbf16, #tpu.memory_space<vmem>>, vector<32x64xbf16>
    %c80 = arith.constant 80 : index
    %c0_3 = arith.constant 0 : index
    %5 = vector.load %arg1[%c80, %c0_3] : memref<176x128xbf16, #tpu.memory_space<vmem>>, vector<64x32xbf16>
    %c144 = arith.constant 144 : index
    %c0_4 = arith.constant 0 : index
    %6 = vector.load %arg1[%c144, %c0_4] : memref<176x128xbf16, #tpu.memory_space<vmem>>, vector<32x128xbf16>
    %c0_5 = arith.constant 0 : index
    %c0_6 = arith.constant 0 : index
    %7 = vector.load %arg2[%c0_5, %c0_6] : memref<48x128xf32, #tpu.memory_space<vmem>>, vector<1x16xf32>
    %c1 = arith.constant 1 : index
    %c0_7 = arith.constant 0 : index
    %8 = vector.load %arg2[%c1, %c0_7] : memref<48x128xf32, #tpu.memory_space<vmem>>, vector<1x16xf32>
    %c2 = arith.constant 2 : index
    %c0_8 = arith.constant 0 : index
    %9 = vector.load %arg2[%c2, %c0_8] : memref<48x128xf32, #tpu.memory_space<vmem>>, vector<1x32xf32>
    %10 = vector.shape_cast %9 : vector<1x32xf32> to vector<1x32xf32>
    %11 = vector.broadcast %10 : vector<1x32xf32> to vector<16x32xf32>
    %c3 = arith.constant 3 : index
    %c0_9 = arith.constant 0 : index
    %12 = vector.load %arg2[%c3, %c0_9] : memref<48x128xf32, #tpu.memory_space<vmem>>, vector<1x96xf32>
    %13 = vector.shape_cast %12 : vector<1x96xf32> to vector<1x96xf32>
    %14 = vector.broadcast %13 : vector<1x96xf32> to vector<16x96xf32>
    %c4 = arith.constant 4 : index
    %c0_10 = arith.constant 0 : index
    %15 = vector.load %arg2[%c4, %c0_10] : memref<48x128xf32, #tpu.memory_space<vmem>>, vector<1x32xf32>
    %16 = vector.shape_cast %15 : vector<1x32xf32> to vector<1x32xf32>
    %17 = vector.broadcast %16 : vector<1x32xf32> to vector<16x32xf32>
    %c5 = arith.constant 5 : index
    %c0_11 = arith.constant 0 : index
    %18 = vector.load %arg2[%c5, %c0_11] : memref<48x128xf32, #tpu.memory_space<vmem>>, vector<1x32xf32>
    %19 = vector.shape_cast %18 : vector<1x32xf32> to vector<1x32xf32>
    %20 = vector.broadcast %19 : vector<1x32xf32> to vector<16x32xf32>
    %c6 = arith.constant 6 : index
    %c0_12 = arith.constant 0 : index
    %21 = vector.load %arg2[%c6, %c0_12] : memref<48x128xf32, #tpu.memory_space<vmem>>, vector<1x32xf32>
    %22 = vector.shape_cast %21 : vector<1x32xf32> to vector<1x32xf32>
    %23 = vector.broadcast %22 : vector<1x32xf32> to vector<16x32xf32>
    %c7 = arith.constant 7 : index
    %c0_13 = arith.constant 0 : index
    %24 = vector.load %arg2[%c7, %c0_13] : memref<48x128xf32, #tpu.memory_space<vmem>>, vector<1x64xf32>
    %25 = vector.shape_cast %24 : vector<1x64xf32> to vector<1x64xf32>
    %26 = vector.broadcast %25 : vector<1x64xf32> to vector<16x64xf32>
    %c8 = arith.constant 8 : index
    %c0_14 = arith.constant 0 : index
    %27 = vector.load %arg2[%c8, %c0_14] : memref<48x128xf32, #tpu.memory_space<vmem>>, vector<1x32xf32>
    %28 = vector.shape_cast %27 : vector<1x32xf32> to vector<1x32xf32>
    %29 = vector.broadcast %28 : vector<1x32xf32> to vector<16x32xf32>
    %c9 = arith.constant 9 : index
    %c0_15 = arith.constant 0 : index
    %30 = vector.load %arg2[%c9, %c0_15] : memref<48x128xf32, #tpu.memory_space<vmem>>, vector<1x32xf32>
    %31 = vector.shape_cast %30 : vector<1x32xf32> to vector<1x32xf32>
    %32 = vector.broadcast %31 : vector<1x32xf32> to vector<16x32xf32>
    %c10 = arith.constant 10 : index
    %c0_16 = arith.constant 0 : index
    %33 = vector.load %arg2[%c10, %c0_16] : memref<48x128xf32, #tpu.memory_space<vmem>>, vector<1x32xf32>
    %34 = vector.shape_cast %33 : vector<1x32xf32> to vector<1x32xf32>
    %35 = vector.broadcast %34 : vector<1x32xf32> to vector<16x32xf32>
    %c11 = arith.constant 11 : index
    %c0_17 = arith.constant 0 : index
    %36 = vector.load %arg2[%c11, %c0_17] : memref<48x128xf32, #tpu.memory_space<vmem>>, vector<1x128xf32>
    %37 = vector.shape_cast %36 : vector<1x128xf32> to vector<1x128xf32>
    %38 = vector.broadcast %37 : vector<1x128xf32> to vector<16x128xf32>
    %c16_18 = arith.constant 16 : index
    %c0_19 = arith.constant 0 : index
    %39 = vector.load %arg2[%c16_18, %c0_19] : memref<48x128xf32, #tpu.memory_space<vmem>>, vector<16x16xf32>
    %c32 = arith.constant 32 : index
    %c0_20 = arith.constant 0 : index
    %40 = vector.load %arg2[%c32, %c0_20] : memref<48x128xf32, #tpu.memory_space<vmem>>, vector<16x16xf32>
    %c0_21 = arith.constant 0 : index
    %c0_22 = arith.constant 0 : index
    %41 = vector.load %arg0[%c0_21, %c0_22] : memref<16x1xi32, #tpu.memory_space<vmem>>, vector<16x1xi32>
    %42 = tpu.iota {dimensions = array<i32: 1>} : vector<16x16xi32>
    %43 = vector.broadcast %41 : vector<16x1xi32> to vector<16x16xi32>
    %44 = arith.cmpi eq, %43, %42 : vector<16x16xi32>
    %cst = arith.constant 1.000000e+00 : f32
    %cst_23 = arith.constant 0.000000e+00 : f32
    %45 = vector.broadcast %cst : f32 to vector<16x16xf32>
    %46 = vector.broadcast %cst_23 : f32 to vector<16x16xf32>
    %47 = arith.select %44, %45, %46 : vector<16x16xi1>, vector<16x16xf32>
    %cst_24 = arith.constant dense<0.000000e+00> : vector<16x16xf32>
    %48 = tpu.matmul %47, %39, %cst_24 {dimension_numbers = #tpu.dot_dimension_numbers<[1], [0], [0], [1], [0, 0, 1, 1], [], []>} : vector<16x16xf32>, vector<16x16xf32>, vector<16x16xf32> -> vector<16x16xf32>
    %49 = arith.addf %48, %40 : vector<16x16xf32>
    %cst_25 = arith.constant dense<0.000000e+00> : vector<16xf32>
    %50 = vector.multi_reduction <add>, %49, %cst_25 [1] : vector<16x16xf32> to vector<16xf32>
    %51 = vector.shape_cast %50 : vector<16xf32> to vector<16x1xf32>
    %cst_26 = arith.constant 1.600000e+01 : f32
    %52 = vector.broadcast %cst_26 : f32 to vector<16x1xf32>
    %53 = arith.divf %51, %52 : vector<16x1xf32>
    %54 = vector.broadcast %53 : vector<16x1xf32> to vector<16x16xf32>
    %55 = arith.subf %49, %54 : vector<16x16xf32>
    %56 = arith.mulf %55, %55 : vector<16x16xf32>
    %cst_27 = arith.constant dense<0.000000e+00> : vector<16xf32>
    %57 = vector.multi_reduction <add>, %56, %cst_27 [1] : vector<16x16xf32> to vector<16xf32>
    %58 = vector.shape_cast %57 : vector<16xf32> to vector<16x1xf32>
    %cst_28 = arith.constant 1.600000e+01 : f32
    %59 = vector.broadcast %cst_28 : f32 to vector<16x1xf32>
    %60 = arith.divf %58, %59 : vector<16x1xf32>
    %61 = vector.broadcast %53 : vector<16x1xf32> to vector<16x16xf32>
    %62 = arith.subf %49, %61 : vector<16x16xf32>
    %cst_29 = arith.constant 9.99999996E-13 : f32
    %63 = vector.broadcast %cst_29 : f32 to vector<16x1xf32>
    %64 = arith.addf %60, %63 : vector<16x1xf32>
    %65 = math.rsqrt %64 : vector<16x1xf32>
    %66 = vector.broadcast %65 : vector<16x1xf32> to vector<16x16xf32>
    %67 = arith.mulf %62, %66 : vector<16x16xf32>
    %68 = vector.broadcast %7 : vector<1x16xf32> to vector<16x16xf32>
    %69 = arith.mulf %67, %68 : vector<16x16xf32>
    %70 = vector.broadcast %8 : vector<1x16xf32> to vector<16x16xf32>
    %71 = arith.addf %69, %70 : vector<16x16xf32>
    %72 = arith.truncf %71 : vector<16x16xf32> to vector<16x16xbf16>
    %cst_30 = arith.constant dense<0.000000e+00> : vector<16x32xf32>
    %73 = tpu.matmul %72, %0, %cst_30 {dimension_numbers = #tpu.dot_dimension_numbers<[1], [0], [0], [1], [0, 0, 1, 1], [], []>} : vector<16x16xbf16>, vector<16x32xbf16>, vector<16x32xf32> -> vector<16x32xf32>
    %74 = arith.addf %73, %11 : vector<16x32xf32>
    %75 = arith.truncf %74 : vector<16x32xf32> to vector<16x32xbf16>
    %cst_31 = arith.constant dense<0.000000e+00> : vector<16x96xf32>
    %76 = tpu.matmul %75, %2, %cst_31 {dimension_numbers = #tpu.dot_dimension_numbers<[1], [0], [0], [1], [0, 0, 1, 1], [], []>} : vector<16x32xbf16>, vector<32x96xbf16>, vector<16x96xf32> -> vector<16x96xf32>
    %77 = arith.addf %76, %14 : vector<16x96xf32>
    %78 = arith.truncf %77 : vector<16x96xf32> to vector<16x96xbf16>
    %79 = vector.shape_cast %78 : vector<16x96xbf16> to vector<2x8x96xbf16>
    %80 = vector.extract_strided_slice %79 {offsets = [0, 0, 0], sizes = [2, 8, 8], strides = [1, 1, 1]} : vector<2x8x96xbf16> to vector<2x8x8xbf16>
    %81 = vector.extract_strided_slice %79 {offsets = [0, 0, 8], sizes = [2, 8, 8], strides = [1, 1, 1]} : vector<2x8x96xbf16> to vector<2x8x8xbf16>
    %82 = vector.extract_strided_slice %79 {offsets = [0, 0, 16], sizes = [2, 8, 8], strides = [1, 1, 1]} : vector<2x8x96xbf16> to vector<2x8x8xbf16>
    %83 = vector.extract_strided_slice %79 {offsets = [0, 0, 24], sizes = [2, 8, 8], strides = [1, 1, 1]} : vector<2x8x96xbf16> to vector<2x8x8xbf16>
    %84 = tpu.concatenate %80, %81, %82, %83 in 0 : vector<2x8x8xbf16>, vector<2x8x8xbf16>, vector<2x8x8xbf16>, vector<2x8x8xbf16> -> vector<8x8x8xbf16>
    %85 = vector.extract_strided_slice %79 {offsets = [0, 0, 32], sizes = [2, 8, 8], strides = [1, 1, 1]} : vector<2x8x96xbf16> to vector<2x8x8xbf16>
    %86 = vector.extract_strided_slice %79 {offsets = [0, 0, 40], sizes = [2, 8, 8], strides = [1, 1, 1]} : vector<2x8x96xbf16> to vector<2x8x8xbf16>
    %87 = vector.extract_strided_slice %79 {offsets = [0, 0, 48], sizes = [2, 8, 8], strides = [1, 1, 1]} : vector<2x8x96xbf16> to vector<2x8x8xbf16>
    %88 = vector.extract_strided_slice %79 {offsets = [0, 0, 56], sizes = [2, 8, 8], strides = [1, 1, 1]} : vector<2x8x96xbf16> to vector<2x8x8xbf16>
    %89 = tpu.concatenate %85, %86, %87, %88 in 0 : vector<2x8x8xbf16>, vector<2x8x8xbf16>, vector<2x8x8xbf16>, vector<2x8x8xbf16> -> vector<8x8x8xbf16>
    %90 = vector.extract_strided_slice %79 {offsets = [0, 0, 64], sizes = [2, 8, 8], strides = [1, 1, 1]} : vector<2x8x96xbf16> to vector<2x8x8xbf16>
    %91 = vector.extract_strided_slice %79 {offsets = [0, 0, 72], sizes = [2, 8, 8], strides = [1, 1, 1]} : vector<2x8x96xbf16> to vector<2x8x8xbf16>
    %92 = vector.extract_strided_slice %79 {offsets = [0, 0, 80], sizes = [2, 8, 8], strides = [1, 1, 1]} : vector<2x8x96xbf16> to vector<2x8x8xbf16>
    %93 = vector.extract_strided_slice %79 {offsets = [0, 0, 88], sizes = [2, 8, 8], strides = [1, 1, 1]} : vector<2x8x96xbf16> to vector<2x8x8xbf16>
    %94 = tpu.concatenate %90, %91, %92, %93 in 0 : vector<2x8x8xbf16>, vector<2x8x8xbf16>, vector<2x8x8xbf16>, vector<2x8x8xbf16> -> vector<8x8x8xbf16>
    "tpu.trace_start"() <{level = 10 : i32, message = "bqd,bkd->bqk"}> : () -> ()
    %cst_32 = arith.constant dense<0.000000e+00> : vector<8x8x8xf32>
    %95 = tpu.matmul %84, %89, %cst_32 {dimension_numbers = #tpu.dot_dimension_numbers<[2], [2], [1], [1], [0, 0, 0, 1, 1, 1], [0], [0]>} : vector<8x8x8xbf16>, vector<8x8x8xbf16>, vector<8x8x8xf32> -> vector<8x8x8xf32>
    "tpu.trace_stop"() : () -> ()
    %cst_33 = arith.constant dense<0xFF800000> : vector<8x8xf32>
    %96 = vector.multi_reduction <maximumf>, %95, %cst_33 [2] : vector<8x8x8xf32> to vector<8x8xf32>
    %97 = vector.shape_cast %96 : vector<8x8xf32> to vector<8x8x1xf32>
    %98 = vector.broadcast %97 : vector<8x8x1xf32> to vector<8x8x8xf32>
    %99 = arith.subf %95, %98 : vector<8x8x8xf32>
    %100 = math.exp %99 : vector<8x8x8xf32>
    %cst_34 = arith.constant dense<0.000000e+00> : vector<8x8xf32>
    %101 = vector.multi_reduction <add>, %100, %cst_34 [2] : vector<8x8x8xf32> to vector<8x8xf32>
    %102 = vector.shape_cast %101 : vector<8x8xf32> to vector<8x8x1xf32>
    %103 = tpu.reciprocal %102 {approx = true} : vector<8x8x1xf32> -> vector<8x8x1xf32>
    %104 = vector.broadcast %103 : vector<8x8x1xf32> to vector<8x8x8xf32>
    %105 = arith.mulf %100, %104 : vector<8x8x8xf32>
    %106 = arith.truncf %105 : vector<8x8x8xf32> to vector<8x8x8xbf16>
    "tpu.trace_start"() <{level = 10 : i32, message = "bqk,bkd->bqd"}> : () -> ()
    %cst_35 = arith.constant dense<0.000000e+00> : vector<8x8x8xf32>
    %107 = tpu.matmul %106, %94, %cst_35 {dimension_numbers = #tpu.dot_dimension_numbers<[2], [1], [1], [2], [0, 0, 0, 1, 1, 2], [0], [0]>} : vector<8x8x8xbf16>, vector<8x8x8xbf16>, vector<8x8x8xf32> -> vector<8x8x8xf32>
    "tpu.trace_stop"() : () -> ()
    %108 = vector.extract_strided_slice %107 {offsets = [0, 0, 0], sizes = [2, 8, 8], strides = [1, 1, 1]} : vector<8x8x8xf32> to vector<2x8x8xf32>
    %109 = vector.extract_strided_slice %107 {offsets = [2, 0, 0], sizes = [2, 8, 8], strides = [1, 1, 1]} : vector<8x8x8xf32> to vector<2x8x8xf32>
    %110 = vector.extract_strided_slice %107 {offsets = [4, 0, 0], sizes = [2, 8, 8], strides = [1, 1, 1]} : vector<8x8x8xf32> to vector<2x8x8xf32>
    %111 = vector.extract_strided_slice %107 {offsets = [6, 0, 0], sizes = [2, 8, 8], strides = [1, 1, 1]} : vector<8x8x8xf32> to vector<2x8x8xf32>
    %112 = tpu.concatenate %108, %109, %110, %111 in 2 : vector<2x8x8xf32>, vector<2x8x8xf32>, vector<2x8x8xf32>, vector<2x8x8xf32> -> vector<2x8x32xf32>
    %113 = vector.shape_cast %112 : vector<2x8x32xf32> to vector<16x32xf32>
    %114 = arith.truncf %113 : vector<16x32xf32> to vector<16x32xbf16>
    %cst_36 = arith.constant dense<0.000000e+00> : vector<16x32xf32>
    %115 = tpu.matmul %114, %3, %cst_36 {dimension_numbers = #tpu.dot_dimension_numbers<[1], [0], [0], [1], [0, 0, 1, 1], [], []>} : vector<16x32xbf16>, vector<32x32xbf16>, vector<16x32xf32> -> vector<16x32xf32>
    %116 = arith.addf %115, %17 : vector<16x32xf32>
    %117 = arith.addf %74, %116 : vector<16x32xf32>
    %cst_37 = arith.constant dense<0.000000e+00> : vector<16xf32>
    %118 = vector.multi_reduction <add>, %117, %cst_37 [1] : vector<16x32xf32> to vector<16xf32>
    %119 = vector.shape_cast %118 : vector<16xf32> to vector<16x1xf32>
    %cst_38 = arith.constant 3.200000e+01 : f32
    %120 = vector.broadcast %cst_38 : f32 to vector<16x1xf32>
    %121 = arith.divf %119, %120 : vector<16x1xf32>
    %122 = vector.broadcast %121 : vector<16x1xf32> to vector<16x32xf32>
    %123 = arith.subf %117, %122 : vector<16x32xf32>
    %124 = arith.mulf %123, %123 : vector<16x32xf32>
    %cst_39 = arith.constant dense<0.000000e+00> : vector<16xf32>
    %125 = vector.multi_reduction <add>, %124, %cst_39 [1] : vector<16x32xf32> to vector<16xf32>
    %126 = vector.shape_cast %125 : vector<16xf32> to vector<16x1xf32>
    %cst_40 = arith.constant 3.200000e+01 : f32
    %127 = vector.broadcast %cst_40 : f32 to vector<16x1xf32>
    %128 = arith.divf %126, %127 : vector<16x1xf32>
    %129 = vector.broadcast %121 : vector<16x1xf32> to vector<16x32xf32>
    %130 = arith.subf %117, %129 : vector<16x32xf32>
    %cst_41 = arith.constant 9.99999996E-13 : f32
    %131 = vector.broadcast %cst_41 : f32 to vector<16x1xf32>
    %132 = arith.addf %128, %131 : vector<16x1xf32>
    %133 = math.rsqrt %132 : vector<16x1xf32>
    %134 = vector.broadcast %133 : vector<16x1xf32> to vector<16x32xf32>
    %135 = arith.mulf %130, %134 : vector<16x32xf32>
    %136 = arith.mulf %135, %20 : vector<16x32xf32>
    %137 = arith.addf %136, %23 : vector<16x32xf32>
    %138 = arith.truncf %137 : vector<16x32xf32> to vector<16x32xbf16>
    %cst_42 = arith.constant dense<0.000000e+00> : vector<16x64xf32>
    %139 = tpu.matmul %138, %4, %cst_42 {dimension_numbers = #tpu.dot_dimension_numbers<[1], [0], [0], [1], [0, 0, 1, 1], [], []>} : vector<16x32xbf16>, vector<32x64xbf16>, vector<16x64xf32> -> vector<16x64xf32>
    %140 = arith.addf %139, %26 : vector<16x64xf32>
    %141 = arith.mulf %140, %140 : vector<16x64xf32>
    %142 = arith.mulf %140, %141 : vector<16x64xf32>
    %cst_43 = arith.constant 4.471500e-02 : f32
    %143 = vector.broadcast %cst_43 : f32 to vector<16x64xf32>
    %144 = arith.mulf %143, %142 : vector<16x64xf32>
    %145 = arith.addf %140, %144 : vector<16x64xf32>
    %cst_44 = arith.constant 0.797884583 : f32
    %146 = vector.broadcast %cst_44 : f32 to vector<16x64xf32>
    %147 = arith.mulf %146, %145 : vector<16x64xf32>
    %148 = math.tanh %147 : vector<16x64xf32>
    %cst_45 = arith.constant 1.000000e+00 : f32
    %149 = vector.broadcast %cst_45 : f32 to vector<16x64xf32>
    %150 = arith.addf %149, %148 : vector<16x64xf32>
    %cst_46 = arith.constant 5.000000e-01 : f32
    %151 = vector.broadcast %cst_46 : f32 to vector<16x64xf32>
    %152 = arith.mulf %151, %150 : vector<16x64xf32>
    %153 = arith.mulf %140, %152 : vector<16x64xf32>
    %154 = arith.truncf %153 : vector<16x64xf32> to vector<16x64xbf16>
    %cst_47 = arith.constant dense<0.000000e+00> : vector<16x32xf32>
    %155 = tpu.matmul %154, %5, %cst_47 {dimension_numbers = #tpu.dot_dimension_numbers<[1], [0], [0], [1], [0, 0, 1, 1], [], []>} : vector<16x64xbf16>, vector<64x32xbf16>, vector<16x32xf32> -> vector<16x32xf32>
    %156 = arith.addf %155, %29 : vector<16x32xf32>
    %157 = arith.addf %137, %156 : vector<16x32xf32>
    %cst_48 = arith.constant dense<0.000000e+00> : vector<16xf32>
    %158 = vector.multi_reduction <add>, %157, %cst_48 [1] : vector<16x32xf32> to vector<16xf32>
    %159 = vector.shape_cast %158 : vector<16xf32> to vector<16x1xf32>
    %cst_49 = arith.constant 3.200000e+01 : f32
    %160 = vector.broadcast %cst_49 : f32 to vector<16x1xf32>
    %161 = arith.divf %159, %160 : vector<16x1xf32>
    %162 = vector.broadcast %161 : vector<16x1xf32> to vector<16x32xf32>
    %163 = arith.subf %157, %162 : vector<16x32xf32>
    %164 = arith.mulf %163, %163 : vector<16x32xf32>
    %cst_50 = arith.constant dense<0.000000e+00> : vector<16xf32>
    %165 = vector.multi_reduction <add>, %164, %cst_50 [1] : vector<16x32xf32> to vector<16xf32>
    %166 = vector.shape_cast %165 : vector<16xf32> to vector<16x1xf32>
    %cst_51 = arith.constant 3.200000e+01 : f32
    %167 = vector.broadcast %cst_51 : f32 to vector<16x1xf32>
    %168 = arith.divf %166, %167 : vector<16x1xf32>
    %169 = vector.broadcast %161 : vector<16x1xf32> to vector<16x32xf32>
    %170 = arith.subf %157, %169 : vector<16x32xf32>
    %cst_52 = arith.constant 9.99999996E-13 : f32
    %171 = vector.broadcast %cst_52 : f32 to vector<16x1xf32>
    %172 = arith.addf %168, %171 : vector<16x1xf32>
    %173 = math.rsqrt %172 : vector<16x1xf32>
    %174 = vector.broadcast %173 : vector<16x1xf32> to vector<16x32xf32>
    %175 = arith.mulf %170, %174 : vector<16x32xf32>
    %176 = arith.mulf %175, %32 : vector<16x32xf32>
    %177 = arith.addf %176, %35 : vector<16x32xf32>
    %178 = arith.truncf %177 : vector<16x32xf32> to vector<16x32xbf16>
    %cst_53 = arith.constant dense<0.000000e+00> : vector<16x96xf32>
    %179 = tpu.matmul %178, %2, %cst_53 {dimension_numbers = #tpu.dot_dimension_numbers<[1], [0], [0], [1], [0, 0, 1, 1], [], []>} : vector<16x32xbf16>, vector<32x96xbf16>, vector<16x96xf32> -> vector<16x96xf32>
    %180 = arith.addf %179, %14 : vector<16x96xf32>
    %181 = arith.truncf %180 : vector<16x96xf32> to vector<16x96xbf16>
    %182 = vector.shape_cast %181 : vector<16x96xbf16> to vector<2x8x96xbf16>
    %183 = vector.extract_strided_slice %182 {offsets = [0, 0, 0], sizes = [2, 8, 8], strides = [1, 1, 1]} : vector<2x8x96xbf16> to vector<2x8x8xbf16>
    %184 = vector.extract_strided_slice %182 {offsets = [0, 0, 8], sizes = [2, 8, 8], strides = [1, 1, 1]} : vector<2x8x96xbf16> to vector<2x8x8xbf16>
    %185 = vector.extract_strided_slice %182 {offsets = [0, 0, 16], sizes = [2, 8, 8], strides = [1, 1, 1]} : vector<2x8x96xbf16> to vector<2x8x8xbf16>
    %186 = vector.extract_strided_slice %182 {offsets = [0, 0, 24], sizes = [2, 8, 8], strides = [1, 1, 1]} : vector<2x8x96xbf16> to vector<2x8x8xbf16>
    %187 = tpu.concatenate %183, %184, %185, %186 in 0 : vector<2x8x8xbf16>, vector<2x8x8xbf16>, vector<2x8x8xbf16>, vector<2x8x8xbf16> -> vector<8x8x8xbf16>
    %188 = vector.extract_strided_slice %182 {offsets = [0, 0, 32], sizes = [2, 8, 8], strides = [1, 1, 1]} : vector<2x8x96xbf16> to vector<2x8x8xbf16>
    %189 = vector.extract_strided_slice %182 {offsets = [0, 0, 40], sizes = [2, 8, 8], strides = [1, 1, 1]} : vector<2x8x96xbf16> to vector<2x8x8xbf16>
    %190 = vector.extract_strided_slice %182 {offsets = [0, 0, 48], sizes = [2, 8, 8], strides = [1, 1, 1]} : vector<2x8x96xbf16> to vector<2x8x8xbf16>
    %191 = vector.extract_strided_slice %182 {offsets = [0, 0, 56], sizes = [2, 8, 8], strides = [1, 1, 1]} : vector<2x8x96xbf16> to vector<2x8x8xbf16>
    %192 = tpu.concatenate %188, %189, %190, %191 in 0 : vector<2x8x8xbf16>, vector<2x8x8xbf16>, vector<2x8x8xbf16>, vector<2x8x8xbf16> -> vector<8x8x8xbf16>
    %193 = vector.extract_strided_slice %182 {offsets = [0, 0, 64], sizes = [2, 8, 8], strides = [1, 1, 1]} : vector<2x8x96xbf16> to vector<2x8x8xbf16>
    %194 = vector.extract_strided_slice %182 {offsets = [0, 0, 72], sizes = [2, 8, 8], strides = [1, 1, 1]} : vector<2x8x96xbf16> to vector<2x8x8xbf16>
    %195 = vector.extract_strided_slice %182 {offsets = [0, 0, 80], sizes = [2, 8, 8], strides = [1, 1, 1]} : vector<2x8x96xbf16> to vector<2x8x8xbf16>
    %196 = vector.extract_strided_slice %182 {offsets = [0, 0, 88], sizes = [2, 8, 8], strides = [1, 1, 1]} : vector<2x8x96xbf16> to vector<2x8x8xbf16>
    %197 = tpu.concatenate %193, %194, %195, %196 in 0 : vector<2x8x8xbf16>, vector<2x8x8xbf16>, vector<2x8x8xbf16>, vector<2x8x8xbf16> -> vector<8x8x8xbf16>
    "tpu.trace_start"() <{level = 10 : i32, message = "bqd,bkd->bqk"}> : () -> ()
    %cst_54 = arith.constant dense<0.000000e+00> : vector<8x8x8xf32>
    %198 = tpu.matmul %187, %192, %cst_54 {dimension_numbers = #tpu.dot_dimension_numbers<[2], [2], [1], [1], [0, 0, 0, 1, 1, 1], [0], [0]>} : vector<8x8x8xbf16>, vector<8x8x8xbf16>, vector<8x8x8xf32> -> vector<8x8x8xf32>
    "tpu.trace_stop"() : () -> ()
    %cst_55 = arith.constant dense<0xFF800000> : vector<8x8xf32>
    %199 = vector.multi_reduction <maximumf>, %198, %cst_55 [2] : vector<8x8x8xf32> to vector<8x8xf32>
    %200 = vector.shape_cast %199 : vector<8x8xf32> to vector<8x8x1xf32>
    %201 = vector.broadcast %200 : vector<8x8x1xf32> to vector<8x8x8xf32>
    %202 = arith.subf %198, %201 : vector<8x8x8xf32>
    %203 = math.exp %202 : vector<8x8x8xf32>
    %cst_56 = arith.constant dense<0.000000e+00> : vector<8x8xf32>
    %204 = vector.multi_reduction <add>, %203, %cst_56 [2] : vector<8x8x8xf32> to vector<8x8xf32>
    %205 = vector.shape_cast %204 : vector<8x8xf32> to vector<8x8x1xf32>
    %206 = tpu.reciprocal %205 {approx = true} : vector<8x8x1xf32> -> vector<8x8x1xf32>
    %207 = vector.broadcast %206 : vector<8x8x1xf32> to vector<8x8x8xf32>
    %208 = arith.mulf %203, %207 : vector<8x8x8xf32>
    %209 = arith.truncf %208 : vector<8x8x8xf32> to vector<8x8x8xbf16>
    "tpu.trace_start"() <{level = 10 : i32, message = "bqk,bkd->bqd"}> : () -> ()
    %cst_57 = arith.constant dense<0.000000e+00> : vector<8x8x8xf32>
    %210 = tpu.matmul %209, %197, %cst_57 {dimension_numbers = #tpu.dot_dimension_numbers<[2], [1], [1], [2], [0, 0, 0, 1, 1, 2], [0], [0]>} : vector<8x8x8xbf16>, vector<8x8x8xbf16>, vector<8x8x8xf32> -> vector<8x8x8xf32>
    "tpu.trace_stop"() : () -> ()
    %211 = vector.extract_strided_slice %210 {offsets = [0, 0, 0], sizes = [2, 8, 8], strides = [1, 1, 1]} : vector<8x8x8xf32> to vector<2x8x8xf32>
    %212 = vector.extract_strided_slice %210 {offsets = [2, 0, 0], sizes = [2, 8, 8], strides = [1, 1, 1]} : vector<8x8x8xf32> to vector<2x8x8xf32>
    %213 = vector.extract_strided_slice %210 {offsets = [4, 0, 0], sizes = [2, 8, 8], strides = [1, 1, 1]} : vector<8x8x8xf32> to vector<2x8x8xf32>
    %214 = vector.extract_strided_slice %210 {offsets = [6, 0, 0], sizes = [2, 8, 8], strides = [1, 1, 1]} : vector<8x8x8xf32> to vector<2x8x8xf32>
    %215 = tpu.concatenate %211, %212, %213, %214 in 2 : vector<2x8x8xf32>, vector<2x8x8xf32>, vector<2x8x8xf32>, vector<2x8x8xf32> -> vector<2x8x32xf32>
    %216 = vector.shape_cast %215 : vector<2x8x32xf32> to vector<16x32xf32>
    %217 = arith.truncf %216 : vector<16x32xf32> to vector<16x32xbf16>
    %cst_58 = arith.constant dense<0.000000e+00> : vector<16x32xf32>
    %218 = tpu.matmul %217, %3, %cst_58 {dimension_numbers = #tpu.dot_dimension_numbers<[1], [0], [0], [1], [0, 0, 1, 1], [], []>} : vector<16x32xbf16>, vector<32x32xbf16>, vector<16x32xf32> -> vector<16x32xf32>
    %219 = arith.addf %218, %17 : vector<16x32xf32>
    %220 = arith.addf %177, %219 : vector<16x32xf32>
    %cst_59 = arith.constant dense<0.000000e+00> : vector<16xf32>
    %221 = vector.multi_reduction <add>, %220, %cst_59 [1] : vector<16x32xf32> to vector<16xf32>
    %222 = vector.shape_cast %221 : vector<16xf32> to vector<16x1xf32>
    %cst_60 = arith.constant 3.200000e+01 : f32
    %223 = vector.broadcast %cst_60 : f32 to vector<16x1xf32>
    %224 = arith.divf %222, %223 : vector<16x1xf32>
    %225 = vector.broadcast %224 : vector<16x1xf32> to vector<16x32xf32>
    %226 = arith.subf %220, %225 : vector<16x32xf32>
    %227 = arith.mulf %226, %226 : vector<16x32xf32>
    %cst_61 = arith.constant dense<0.000000e+00> : vector<16xf32>
    %228 = vector.multi_reduction <add>, %227, %cst_61 [1] : vector<16x32xf32> to vector<16xf32>
    %229 = vector.shape_cast %228 : vector<16xf32> to vector<16x1xf32>
    %cst_62 = arith.constant 3.200000e+01 : f32
    %230 = vector.broadcast %cst_62 : f32 to vector<16x1xf32>
    %231 = arith.divf %229, %230 : vector<16x1xf32>
    %232 = vector.broadcast %224 : vector<16x1xf32> to vector<16x32xf32>
    %233 = arith.subf %220, %232 : vector<16x32xf32>
    %cst_63 = arith.constant 9.99999996E-13 : f32
    %234 = vector.broadcast %cst_63 : f32 to vector<16x1xf32>
    %235 = arith.addf %231, %234 : vector<16x1xf32>
    %236 = math.rsqrt %235 : vector<16x1xf32>
    %237 = vector.broadcast %236 : vector<16x1xf32> to vector<16x32xf32>
    %238 = arith.mulf %233, %237 : vector<16x32xf32>
    %239 = arith.mulf %238, %20 : vector<16x32xf32>
    %240 = arith.addf %239, %23 : vector<16x32xf32>
    %241 = arith.truncf %240 : vector<16x32xf32> to vector<16x32xbf16>
    %cst_64 = arith.constant dense<0.000000e+00> : vector<16x64xf32>
    %242 = tpu.matmul %241, %4, %cst_64 {dimension_numbers = #tpu.dot_dimension_numbers<[1], [0], [0], [1], [0, 0, 1, 1], [], []>} : vector<16x32xbf16>, vector<32x64xbf16>, vector<16x64xf32> -> vector<16x64xf32>
    %243 = arith.addf %242, %26 : vector<16x64xf32>
    %244 = arith.mulf %243, %243 : vector<16x64xf32>
    %245 = arith.mulf %243, %244 : vector<16x64xf32>
    %cst_65 = arith.constant 4.471500e-02 : f32
    %246 = vector.broadcast %cst_65 : f32 to vector<16x64xf32>
    %247 = arith.mulf %246, %245 : vector<16x64xf32>
    %248 = arith.addf %243, %247 : vector<16x64xf32>
    %cst_66 = arith.constant 0.797884583 : f32
    %249 = vector.broadcast %cst_66 : f32 to vector<16x64xf32>
    %250 = arith.mulf %249, %248 : vector<16x64xf32>
    %251 = math.tanh %250 : vector<16x64xf32>
    %cst_67 = arith.constant 1.000000e+00 : f32
    %252 = vector.broadcast %cst_67 : f32 to vector<16x64xf32>
    %253 = arith.addf %252, %251 : vector<16x64xf32>
    %cst_68 = arith.constant 5.000000e-01 : f32
    %254 = vector.broadcast %cst_68 : f32 to vector<16x64xf32>
    %255 = arith.mulf %254, %253 : vector<16x64xf32>
    %256 = arith.mulf %243, %255 : vector<16x64xf32>
    %257 = arith.truncf %256 : vector<16x64xf32> to vector<16x64xbf16>
    %cst_69 = arith.constant dense<0.000000e+00> : vector<16x32xf32>
    %258 = tpu.matmul %257, %5, %cst_69 {dimension_numbers = #tpu.dot_dimension_numbers<[1], [0], [0], [1], [0, 0, 1, 1], [], []>} : vector<16x64xbf16>, vector<64x32xbf16>, vector<16x32xf32> -> vector<16x32xf32>
    %259 = arith.addf %258, %29 : vector<16x32xf32>
    %260 = arith.addf %240, %259 : vector<16x32xf32>
    %cst_70 = arith.constant dense<0.000000e+00> : vector<16xf32>
    %261 = vector.multi_reduction <add>, %260, %cst_70 [1] : vector<16x32xf32> to vector<16xf32>
    %262 = vector.shape_cast %261 : vector<16xf32> to vector<16x1xf32>
    %cst_71 = arith.constant 3.200000e+01 : f32
    %263 = vector.broadcast %cst_71 : f32 to vector<16x1xf32>
    %264 = arith.divf %262, %263 : vector<16x1xf32>
    %265 = vector.broadcast %264 : vector<16x1xf32> to vector<16x32xf32>
    %266 = arith.subf %260, %265 : vector<16x32xf32>
    %267 = arith.mulf %266, %266 : vector<16x32xf32>
    %cst_72 = arith.constant dense<0.000000e+00> : vector<16xf32>
    %268 = vector.multi_reduction <add>, %267, %cst_72 [1] : vector<16x32xf32> to vector<16xf32>
    %269 = vector.shape_cast %268 : vector<16xf32> to vector<16x1xf32>
    %cst_73 = arith.constant 3.200000e+01 : f32
    %270 = vector.broadcast %cst_73 : f32 to vector<16x1xf32>
    %271 = arith.divf %269, %270 : vector<16x1xf32>
    %272 = vector.broadcast %264 : vector<16x1xf32> to vector<16x32xf32>
    %273 = arith.subf %260, %272 : vector<16x32xf32>
    %cst_74 = arith.constant 9.99999996E-13 : f32
    %274 = vector.broadcast %cst_74 : f32 to vector<16x1xf32>
    %275 = arith.addf %271, %274 : vector<16x1xf32>
    %276 = math.rsqrt %275 : vector<16x1xf32>
    %277 = vector.broadcast %276 : vector<16x1xf32> to vector<16x32xf32>
    %278 = arith.mulf %273, %277 : vector<16x32xf32>
    %279 = arith.mulf %278, %32 : vector<16x32xf32>
    %280 = arith.addf %279, %35 : vector<16x32xf32>
    %281 = arith.truncf %280 : vector<16x32xf32> to vector<16x32xbf16>
    %cst_75 = arith.constant dense<0.000000e+00> : vector<16x128xf32>
    %282 = tpu.matmul %281, %6, %cst_75 {dimension_numbers = #tpu.dot_dimension_numbers<[1], [0], [0], [1], [0, 0, 1, 1], [], []>} : vector<16x32xbf16>, vector<32x128xbf16>, vector<16x128xf32> -> vector<16x128xf32>
    %283 = arith.addf %282, %38 : vector<16x128xf32>
    %c0_76 = arith.constant 0 : index
    %c0_77 = arith.constant 0 : index
    %284 = vector.load %arg3[%c0_76, %c0_77] : memref<16x128xf32, #tpu.memory_space<vmem>>, vector<16x128xf32>
    tpu.vector_store %arg3[%c0_76, %c0_77], %283 {strides = array<i32>} : memref<16x128xf32, #tpu.memory_space<vmem>>, vector<16x128xf32>,
    %c0_78 = arith.constant 0 : index
    %c0_79 = arith.constant 0 : index
    %285 = vector.load %arg3[%c0_78, %c0_79] : memref<16x128xf32, #tpu.memory_space<vmem>>, vector<16x32xf32>
    tpu.vector_store %arg3[%c0_78, %c0_79], %280 {strides = array<i32>} : memref<16x128xf32, #tpu.memory_space<vmem>>, vector<16x32xf32>,
    return
  }
}

</mosaic_0001>

<bundles_post_ra>
// kernel: bbert_forward.1
= control target key start
LH: loop header
LB: loop body
LE: loop exit
PB: predicated region body
PF: predicated region fallthrough
CT: control target
= control target key end

     0   :  { %8 = vsyncpa [#allocation3], 0  ;;  %s2487_s0 = inlined_call_operand.vmem [shape: s32[16,1], index: 0, kind: input, shape index: {}]   ;;  %s2488_s1 = inlined_call_operand.hbm [shape: bf16[176,128], index: 1, kind: input, shape index: {}]   ;;  %s2489_s2 = inlined_call_operand.hbm [shape: f32[48,128], index: 2, kind: input, shape index: {}]   ;;  %s2490_s3 = inlined_call_operand.vmem [shape: f32[16,128], index: 3, kind: output, shape index: {}]  }
   0x1   :  { %s16_s14 = sshll.u32 %s2488_s1, 4  ;;  %s17_s14 = int_to_ptr.hbm [resolvable:$true] %s16_s14 }
   0x2   :  { %9 = vsyncpa [#allocation5], 0  ;;  %s2001_s15 = smov [#allocation2]   ;;  %s29_s19 = sshll.u32 %s2489_s2, 4  ;;  %s30_s19 = int_to_ptr.hbm [resolvable:$true] %s29_s19 }
   0x3   :  { %s18_s16 = sshll.u32 %s2001_s15, 4  ;;  %s2002_s20 = smov 64   ;;  %s19_s16 = int_to_ptr.vmem [resolvable:$true] %s18_s16 }
   0x4   :  { %s2003_s21 = smov 4   ;;  %s2004_s22 = smov [#allocation4]  }
   0x5   :  { %24 = dma.hbm_to_vmem [thread:$0]  %s17_s14, 1408, %s19_s16, [#allocation3], %s2002_s20, %s2002_s20, %s2003_s21  }
   0x6   :  { %s31_s23 = sshll.u32 %s2004_s22, 4  ;;  %s2005_s24 = smov 128   ;;  %s32_s23 = int_to_ptr.vmem [resolvable:$true] %s31_s23 }
   0x7   :  { %s2006_s1 = smov 8  }
   0x8   :  { %37 = dma.hbm_to_vmem [thread:$0]  %s30_s19, 768, %s32_s23, [#allocation5], %s2005_s24, %s2005_s24, %s2006_s1  }
   0x9   :  { %1997 = dma.done.wait [#allocation3], 1408  }
   0xa   :  { %1998 = vsyncadd [#allocation3], 4294965888 }
   0xb   :  { %1999 = dma.done.wait [#allocation5], 768  }
   0xc   :  { %2000 = vsyncadd [#allocation5], 4294966528  ;;  %v2007_v0 = vmov 0   ;;  %v95_v1 = vld [vmem:[%s2487_s0] sm:$0xff]  ;;  %v96_v2 = vld [vmem:[%s2487_s0 + $0x8] sm:$0xff]  ;;  %v97_v5 = vlaneseq  ;;  %vm109_vm0 = vcmask 130048  }
   0xd   :  { %1810 = vset.pattern.permute.xlu0 %v2007_v0  ;;  %v92_v3 = vld [vmem:[#allocation4 + $0x18] sm:$0xff]  ;;  %v91_v4 = vld [vmem:[#allocation4 + $0x10] sm:$0xff]  ;;  %v2008_v8 = vmov 0.0   ;;  %v93_v12 = vld [vmem:[#allocation4 + $0x20] sm:$0xff]  ;;  %v2009_v20 = vmov 16.0   ;;  %vm233_vm10 = vcmask 261120  }
   0xe   :  { %100 = vperm.xlu0 %1810, %v95_v1   ;;  %130 = vmatpush.msra.mxu0 %v92_v3  ;;  %v98_v6 = vand.u32 127, %v97_v5  ;;  %v94_v16 = vld [vmem:[#allocation4 + $0x28] sm:$0xff]  ;;  %1853 = vrcp.f32 %v2009_v20  ;;  %v1841_v57 = vld [vmem:[#allocation4] ss:$0 sm:$0xff]  ;;  %v1842_v62 = vld [vmem:[#allocation4 + $0x1] ss:$0 sm:$0xff] }
   0xf   :  { %v1782_v37 = vld [vmem:[#allocation2] sm:$0xff]  ;;  %v2060_v3 = vld [vmem:[#allocation2 + $0x10] sm:$0xff]  ;;  %s2010_s0 = smov 112   ;;  %s2011_s28 = smov 120   ;;  %vm271_vm11 = vcmask 64512   ;;  %vm553_vm12 = vcmask 1043456  }
  0x10   :  { %131 = vmatpush.msra.mxu0 %v91_v4  ;;  %213 = vmatpush.bf16.msra.mxu1 %v1782_v37  ;;  %v2063_v4 = vld [vmem:[#allocation2 + $0x8] sm:$0xff]  ;;  %s2012_s29 = smov 96   ;;  %s2013_s30 = smov 104   ;;  %vm745_vm13 = vcmask 195584  }
  0x11   :  { %243 = vmatpush.bf16.msra.mxu2 %v2060_v3  ;;  %s2014_s4 = smov 32   ;;  %s2015_s5 = smov 24  }
  0x12   :  { %s2016_s6 = smov 16  }
  0x14   :  { %v1854_v21 = vpop.eup %1853 }
  0x15   :  { %v146_v22 = vmul.f32 16.0, %v1854_v21  ;;  %vm150_vm3 = vweird.f32 %v1854_v21  ;;  %244 = vmatpush.bf16.msra.mxu2 %v2063_v4 }
  0x16   :  { %103 = vperm.xlu0 %1810, %v96_v2  }
  0x17   :  { %v147_v23 = vsub.f32 1.0, %v146_v22 }
  0x19   :  { %v148_v24 = vmul.f32 %v1854_v21, %v147_v23 }
  0x1b   :  { %v149_v25 = vadd.f32 %v1854_v21, %v148_v24 }
  0x1d   :  { %v151_v26 = vsel %vm150_vm3, %v1854_v21, %v149_v25 }
  0x80   :  { %v101_v7 = vpop.permute.xlu0 %100 }
  0x81   :  { %vm105_vm1 = vcmp.eq.s32.totalorder %v101_v7, %v98_v6 }
  0x82   :  { %v107_v9 = vsel %vm105_vm1, 1.0, %v2008_v8 }
  0x83   :  { %1694 = vmatmul.msk.f32.vlgmr.msra.gmra.mxu0 %vm109_vm0, %v107_v9 }
  0x88   :  { %v104_v10 = vpop.permute.xlu0 %103 }
  0x89   :  { %vm106_vm2 = vcmp.eq.s32.totalorder %v104_v10, %v98_v6  ;;  %v1843_v6 = vld [vmem:[#allocation4 + $0x2] ss:$0 sm:$0xff] }
  0x8a   :  { %v108_v11 = vsel %vm106_vm2, 1.0, %v2008_v8 }
  0x8b   :  { %1695 = vmatmul.msk.f32.gmra.mxu0 %vm109_vm0, %v108_v11  ;;  %v2073_v11 = vld [vmem:[#allocation4 + $0x3] ss:$0 sm:$0xff] }
 0x100   :  { %v133_v13 = vpop.f32.mrf.mxu0 }
 0x101   :  { %v134_v14 = vadd.f32 %v133_v13, %v93_v12 }
 0x103   :  { %v139_v15 = vsel %vm109_vm0, %v134_v14, 0.0 }
 0x104   :  { %140 = vadd.xlane.f32.xlu1 %v139_v15 }
 0x108   :  { %v136_v17 = vpop.f32.mrf.mxu0 }
 0x109   :  { %v137_v18 = vadd.f32 %v136_v17, %v94_v16 }
 0x10b   :  { %v142_v19 = vsel %vm109_vm0, %v137_v18, 0.0 }
 0x10c   :  { %143 = vadd.xlane.f32.xlu1 %v142_v19 }
 0x177   :  { %v141_v27 = vpop.xlane.xlu1 %140 }
 0x178   :  { %v152_v28 = vmul.f32 %v151_v26, %v141_v27 }
 0x17a   :  { %v154_v29 = vsub.f32 %v134_v14, %v152_v28 }
 0x17c   :  { %v156_v30 = vmul.f32 %v154_v29, %v154_v29 }
 0x17e   :  { %v158_v31 = vsel %vm109_vm0, %v156_v30, 0.0 }
 0x17f   :  { %159 = vadd.xlane.f32.xlu2 %v158_v31  ;;  %v144_v32 = vpop.xlane.xlu1 %143 }
 0x180   :  { %v153_v33 = vmul.f32 %v151_v26, %v144_v32 }
 0x182   :  { %v155_v34 = vsub.f32 %v137_v18, %v153_v33 }
 0x184   :  { %v157_v35 = vmul.f32 %v155_v34, %v155_v34 }
 0x186   :  { %v161_v36 = vsel %vm109_vm0, %v157_v35, 0.0 }
 0x187   :  { %162 = vadd.xlane.f32.xlu2 %v161_v36 }
 0x1f2   :  { %v160_v38 = vpop.xlane.xlu2 %159 }
 0x1f3   :  { %v164_v39 = vmul.f32 %v160_v38, %v151_v26 }
 0x1f5   :  { %v166_v40 = vadd.f32 1e-12, %v164_v39 }
 0x1f7   :  { %1855 = vrsqrt.f32 %v166_v40  ;;  %vm174_vm5 = vweird.f32 %v166_v40 }
 0x1fa   :  { %v163_v41 = vpop.xlane.xlu2 %162 }
 0x1fb   :  { %v165_v42 = vmul.f32 %v163_v41, %v151_v26 }
 0x1fd   :  { %v1856_v43 = vpop.eup %1855  ;;  %v167_v44 = vadd.f32 1e-12, %v165_v42 }
 0x1fe   :  { %v169_v45 = vmul.f32 %v1856_v43, %v166_v40  ;;  %vm175_vm4 = vweird.f32 %v1856_v43 }
 0x1ff   :  { %1857 = vrsqrt.f32 %v167_v44  ;;  %vm176_vm6 = vmor %vm174_vm5, %vm175_vm4  ;;  %vm184_vm8 = vweird.f32 %v167_v44 }
 0x200   :  { %v170_v46 = vmul.f32 %v1856_v43, %v169_v45 }
 0x202   :  { %v171_v47 = vmul.f32 0.5, %v170_v46 }
 0x204   :  { %v172_v48 = vsub.f32 1.5, %v171_v47 }
 0x205   :  { %v1858_v49 = vpop.eup %1857 }
 0x206   :  { %v173_v50 = vmul.f32 %v1856_v43, %v172_v48  ;;  %v179_v51 = vmul.f32 %v1858_v49, %v167_v44  ;;  %vm185_vm7 = vweird.f32 %v1858_v49 }
 0x207   :  { %vm186_vm9 = vmor %vm184_vm8, %vm185_vm7 }
 0x208   :  { %v180_v52 = vmul.f32 %v1858_v49, %v179_v51  ;;  %v177_v53 = vsel %vm176_vm6, %v1856_v43, %v173_v50  ;;  %vm902_vm6 = vcmask 523264  }
 0x209   :  { %v188_v56 = vmul.f32 %v177_v53, %v154_v29 }
 0x20a   :  { %v181_v54 = vmul.f32 0.5, %v180_v52 }
 0x20b   :  { %v191_v61 = vmul.f32 %v1841_v57, %v188_v56 }
 0x20c   :  { %v182_v55 = vsub.f32 1.5, %v181_v54 }
 0x20d   :  { %v194_v0 = vadd.f32 %v1842_v62, %v191_v61 }
 0x20e   :  { %v183_v58 = vmul.f32 %v1858_v49, %v182_v55 }
 0x210   :  { %v187_v59 = vsel %vm186_vm9, %v1858_v49, %v183_v58 }
 0x211   :  { %v189_v60 = vmul.f32 %v187_v59, %v155_v34 }
 0x213   :  { %v192_v63 = vmul.f32 %v1841_v57, %v189_v60 }
 0x215   :  { %v195_v1 = vadd.f32 %v1842_v62, %v192_v63 }
 0x217   :  { %v196_v2 = vpack.c.bf16 %v195_v1, %v194_v0 }
 0x219   :  { %1700 = vmatmul.msk.bf16.vlgmr.msra.gmra.mxu1 %vm109_vm0, %v196_v2 }
 0x296   :  { %v215_v5 = vpop.f32.mrf.mxu1 }
 0x297   :  { %v2066_v8 = vadd.f32 %v1843_v6, %v215_v5 }
 0x29e   :  { %v217_v7 = vpop.f32.mrf.mxu1 }
 0x29f   :  { %v2068_v9 = vadd.f32 %v1843_v6, %v217_v7 }
 0x2a1   :  { %v220_v10 = vpack.c.bf16 %v2068_v9, %v2066_v8 }
 0x2a3   :  { %1709 = vmatmul.msk.bf16.vlgmr.msra.gmra.mxu2 %vm233_vm10, %v220_v10 }
 0x326   :  { %v246_v12 = vpop.f32.mrf.mxu2 }
 0x327   :  { %v247_v13 = vadd.f32 %v2073_v11, %v246_v12 }
 0x329   :  { %v251_v14 = vpack.c.bf16 %v247_v13, %v247_v13 }
 0x32b   :  { %259 = vrot.lane.b32.xlu2 %v251_v14, %s2010_s0  ;;  %255 = vrot.lane.b32.xlu1 %v251_v14, %s2011_s28  ;;  %v267_v15 = vunpack.c.l.b16 %v251_v14 }
 0x32d   :  { %v2079_v19 = vpack.c.b16 %v267_v15, %v267_v15 }
 0x32e   :  { %v248_v16 = vpop.f32.mrf.mxu2 }
 0x32f   :  { %v249_v17 = vadd.f32 %v2073_v11, %v248_v16 }
 0x331   :  { %v252_v18 = vpack.c.bf16 %v249_v17, %v249_v17 }
 0x333   :  { %257 = vrot.lane.b32.xlu0 %v252_v18, %s2011_s28  ;;  %269 = vrot.lane.b32.xlu2 %v2079_v19, %s2012_s29  ;;  %v291_v20 = vunpack.c.l.b16 %v252_v18 }
 0x335   :  { %v2087_v21 = vpack.c.b16 %v291_v20, %v291_v20 }
 0x33b   :  { %265 = vrot.lane.b32.xlu0 %v252_v18, %s2013_s30 }
 0x343   :  { %261 = vrot.lane.b32.xlu0 %v252_v18, %s2010_s0 }
 0x34b   :  { %263 = vrot.lane.b32.xlu0 %v251_v14, %s2013_s30 }
 0x353   :  { %293 = vrot.lane.b32.xlu0 %v2087_v21, %s2012_s29 }
 0x385   :  { %v260_v22 = vpop.permute.xlu2 %259 }
 0x386   :  { %v360_v31 = vunpack.c.l.b16 %v260_v22 }
 0x388   :  { %v2101_v34 = vpack.c.b16 %v360_v31, %v360_v31 }
 0x38d   :  { %v270_v23 = vpop.permute.xlu2 %269 }
 0x38e   :  { %v276_v24 = vsel %vm271_vm11, %v270_v23, 0 }
 0x38f   :  { %285 = vmatpush.bf16.xpose.msra.mxu3 %v276_v24 }
 0x396   :  { %1710 = vmatmul.msk.bf16.vlgmr.msra.gmra.mxu3 %vm271_vm11, %v251_v14 }
 0x39d   :  { %v256_v25 = vpop.permute.xlu1 %255 }
 0x39e   :  { %v314_v26 = vunpack.c.l.b16 %v256_v25 }
 0x3a0   :  { %v2093_v27 = vpack.c.b16 %v314_v26, %v314_v26 }
 0x3a2   :  { %316 = vrot.lane.b32.xlu2 %v2093_v27, %s2012_s29 }
 0x3a5   :  { %v258_v28 = vpop.permute.xlu0 %257 }
 0x3a6   :  { %v337_v29 = vunpack.c.l.b16 %v258_v28 }
 0x3a8   :  { %v2097_v30 = vpack.c.b16 %v337_v29, %v337_v29 }
 0x3aa   :  { %339 = vrot.lane.b32.xlu1 %v2097_v30, %s2012_s29 }
 0x3ad   :  { %v266_v32 = vpop.permute.xlu0 %265 }
 0x3ae   :  { %v429_v33 = vunpack.c.l.b16 %v266_v32 }
 0x3b0   :  { %v2103_v35 = vpack.c.b16 %v429_v33, %v429_v33 }
 0x3b2   :  { %431 = vrot.lane.b32.xlu0 %v2103_v35, %s2012_s29  ;;  %362 = vrot.lane.b32.xlu1 %v2101_v34, %s2012_s29 }
 0x3b5   :  { %v262_v36 = vpop.permute.xlu0 %261 }
 0x3b6   :  { %v383_v37 = vunpack.c.l.b16 %v262_v36 }
 0x3b8   :  { %v2109_v38 = vpack.c.b16 %v383_v37, %v383_v37 }
 0x3ba   :  { %385 = vrot.lane.b32.xlu2 %v2109_v38, %s2012_s29 }
 0x3bd   :  { %v264_v39 = vpop.permute.xlu0 %263 }
 0x3be   :  { %v406_v40 = vunpack.c.l.b16 %v264_v39 }
 0x3c0   :  { %v2113_v41 = vpack.c.b16 %v406_v40, %v406_v40 }
 0x3c2   :  { %408 = vrot.lane.b32.xlu1 %v2113_v41, %s2012_s29 }
 0x3c5   :  { %v294_v42 = vpop.permute.xlu0 %293 }
 0x3c6   :  { %v299_v43 = vsel %vm271_vm11, %v294_v42, 0 }
 0x3c7   :  { %308 = vmatpush.bf16.xpose.msrb.mxu0 %v299_v43 }
 0x3ce   :  { %1711 = vmatmul.msk.bf16.vlgmr.msrb.gmra.mxu0 %vm271_vm11, %v252_v18 }
 0x3fc   :  { %v317_v44 = vpop.permute.xlu2 %316 }
 0x3fd   :  { %v322_v45 = vsel %vm271_vm11, %v317_v44, 0 }
 0x3fe   :  { %331 = vmatpush.bf16.xpose.msrb.mxu1 %v322_v45 }
 0x405   :  { %1712 = vmatmul.msk.bf16.vlgmr.msrb.gmra.mxu1 %vm271_vm11, %v256_v25 }
 0x414   :  { %v386_v46 = vpop.permute.xlu2 %385 }
 0x415   :  { %v391_v47 = vsel %vm271_vm11, %v386_v46, 0 }
 0x416   :  { %400 = vmatpush.bf16.xpose.msra.mxu0 %v391_v47 }
 0x419   :  { %v287_v48 = vpop.f32.mrf.mxu3 }
 0x41a   :  { %v452_v49 = vsel %vm271_vm11, %v287_v48, -inf }
 0x41b   :  { %453 = vmax.xlane.f32.xlu0 %v452_v49 }
 0x41c   :  { %v340_v50 = vpop.permute.xlu1 %339 }
 0x41d   :  { %1715 = vmatmul.msk.bf16.vlgmr.msra.gmra.mxu0 %vm271_vm11, %v262_v36  ;;  %v345_v51 = vsel %vm271_vm11, %v340_v50, 0 }
 0x41e   :  { %354 = vmatpush.bf16.xpose.msrb.mxu2 %v345_v51 }
 0x421   :  { %v289_v52 = vpop.f32.mrf.mxu3 }
 0x424   :  { %v432_v53 = vpop.permute.xlu0 %431  ;;  %v363_v54 = vpop.permute.xlu1 %362 }
 0x425   :  { %v437_v55 = vsel %vm271_vm11, %v432_v53, 0  ;;  %1713 = vmatmul.msk.bf16.vlgmr.msrb.gmra.mxu2 %vm271_vm11, %v258_v28  ;;  %v368_v56 = vsel %vm271_vm11, %v363_v54, 0 }
 0x426   :  { %377 = vmatpush.bf16.xpose.msrb.mxu3 %v368_v56  ;;  %446 = vmatpush.bf16.xpose.msra.mxu2 %v437_v55 }
 0x42d   :  { %1714 = vmatmul.msk.bf16.vlgmr.msrb.gmra.mxu3 %vm271_vm11, %v260_v22 }
 0x434   :  { %v409_v57 = vpop.permute.xlu1 %408 }
 0x435   :  { %v414_v58 = vsel %vm271_vm11, %v409_v57, 0  ;;  %1717 = vmatmul.msk.bf16.vlgmr.msra.gmra.mxu2 %vm271_vm11, %v266_v32 }
 0x436   :  { %423 = vmatpush.bf16.xpose.msra.mxu1 %v414_v58 }
 0x43d   :  { %1716 = vmatmul.msk.bf16.vlgmr.msra.gmra.mxu1 %vm271_vm11, %v264_v39 }
 0x44b   :  { %v310_v59 = vpop.f32.mrf.mxu0 }
 0x44c   :  { %v455_v60 = vsel %vm271_vm11, %v310_v59, -inf }
 0x44d   :  { %456 = vmax.xlane.f32.xlu1 %v455_v60 }
 0x453   :  { %v312_v61 = vpop.f32.mrf.mxu0 }
 0x482   :  { %v333_v62 = vpop.f32.mrf.mxu1 }
 0x483   :  { %v458_v63 = vsel %vm271_vm11, %v333_v62, -inf }
 0x484   :  { %459 = vmax.xlane.f32.xlu2 %v458_v63 }
 0x48a   :  { %v335_v0 = vpop.f32.mrf.mxu1 }
 0x48e   :  { %v454_v1 = vpop.xlane.xlu0 %453 }
 0x48f   :  { %v476_v2 = vsub.f32 %v287_v48, %v454_v1 }
 0x491   :  { %v484_v5 = vmul.f32 1.442695, %v476_v2 }
 0x493   :  { %1859 = vpow2.f32 %v484_v5 }
 0x499   :  { %v1860_v6 = vpop.eup %1859 }
 0x49a   :  { %v402_v7 = vpop.f32.mrf.mxu0  ;;  %v500_v10 = vsel %vm271_vm11, %v1860_v6, 0.0 }
 0x49b   :  { %501 = vadd.xlane.f32.xlu1 %v500_v10  ;;  %v467_v12 = vsel %vm271_vm11, %v402_v7, -inf }
 0x49c   :  { %468 = vmax.xlane.f32.xlu2 %v467_v12 }
 0x4a2   :  { %v404_v13 = vpop.f32.mrf.mxu0 }
 0x4a8   :  { %v356_v14 = vpop.f32.mrf.mxu2 }
 0x4a9   :  { %v461_v15 = vsel %vm271_vm11, %v356_v14, -inf }
 0x4aa   :  { %462 = vmax.xlane.f32.xlu2 %v461_v15 }
 0x4b0   :  { %v358_v16 = vpop.f32.mrf.mxu2  ;;  %v379_v17 = vpop.f32.mrf.mxu3 }
 0x4b1   :  { %v464_v18 = vsel %vm271_vm11, %v379_v17, -inf }
 0x4b2   :  { %465 = vmax.xlane.f32.xlu0 %v464_v18 }
 0x4b8   :  { %v381_v20 = vpop.f32.mrf.mxu3  ;;  %v448_v22 = vpop.f32.mrf.mxu2 }
 0x4b9   :  { %v473_v23 = vsel %vm271_vm11, %v448_v22, -inf }
 0x4ba   :  { %474 = vmax.xlane.f32.xlu1 %v473_v23  ;;  %v2139_v24 = vpop.f32.mrf.mxu1 }
 0x4bb   :  { %v470_v32 = vsel %vm271_vm11, %v2139_v24, -inf }
 0x4c0   :  { %v450_v25 = vpop.f32.mrf.mxu2  ;;  %v457_v28 = vpop.xlane.xlu1 %456 }
 0x4c1   :  { %v477_v29 = vsub.f32 %v310_v59, %v457_v28 }
 0x4c2   :  { %v427_v26 = vpop.f32.mrf.mxu1  ;;  %548 = vrot.lane.b32.xlu2 %v2079_v19, %s2002_s20 }
 0x4c3   :  { %v486_v31 = vmul.f32 1.442695, %v477_v29 }
 0x4c5   :  { %1861 = vpow2.f32 %v486_v31 }
 0x4c6   :  { %612 = vrot.lane.b32.xlu0 %v2097_v30, %s2002_s20 }
 0x4cb   :  { %v2149_v33 = vpop.eup %1861 }
 0x4cc   :  { %v503_v19 = vsel %vm271_vm11, %v2149_v33, 0.0 }
 0x4d3   :  { %570 = vrot.lane.b32.xlu1 %v2087_v21, %s2002_s20 }
 0x4f0   :  { %471 = vmax.xlane.f32.xlu0 %v470_v32 }
 0x4f7   :  { %v460_v36 = vpop.xlane.xlu2 %459 }
 0x4f8   :  { %v478_v37 = vsub.f32 %v333_v62, %v460_v36  ;;  %504 = vadd.xlane.f32.xlu0 %v503_v19 }
 0x4fa   :  { %v488_v30 = vmul.f32 1.442695, %v478_v37 }
 0x4fc   :  { %1863 = vpow2.f32 %v488_v30 }
 0x502   :  { %v2153_v39 = vpop.eup %1863 }
 0x503   :  { %v506_v21 = vsel %vm271_vm11, %v2153_v39, 0.0 }
 0x504   :  { %507 = vadd.xlane.f32.xlu1 %v506_v21 }
 0x50c   :  { %591 = vrot.lane.b32.xlu0 %v2093_v27, %s2002_s20 }
 0x50e   :  { %v502_v42 = vpop.xlane.xlu1 %501 }
 0x50f   :  { %v469_v40 = vpop.xlane.xlu2 %468  ;;  %1865 = vrcp.f32 %v502_v42 }
 0x510   :  { %v481_v46 = vsub.f32 %v402_v7, %v469_v40 }
 0x512   :  { %v494_v52 = vmul.f32 1.442695, %v481_v46 }
 0x515   :  { %v1866_v44 = vpop.eup %1865 }
 0x516   :  { %v532_v45 = vmul.f32 %v1866_v44, %v1860_v6 }
 0x518   :  { %v540_v51 = vpack.c.bf16 %v532_v45, %v532_v45 }
 0x51d   :  { %v463_v43 = vpop.xlane.xlu2 %462 }
 0x51e   :  { %v479_v54 = vsub.f32 %v356_v14, %v463_v43 }
 0x520   :  { %v490_v27 = vmul.f32 1.442695, %v479_v54 }
 0x525   :  { %v466_v47 = vpop.xlane.xlu0 %465  ;;  %v549_v48 = vpop.permute.xlu2 %548 }
 0x526   :  { %v480_v49 = vsub.f32 %v379_v17, %v466_v47  ;;  %v555_v50 = vsel %vm553_vm12, %v549_v48, 0 }
 0x527   :  { %564 = vmatpush.bf16.msra.mxu3 %v555_v50 }
 0x528   :  { %v492_v53 = vmul.f32 1.442695, %v480_v49 }
 0x52a   :  { %1867 = vpow2.f32 %v492_v53  ;;  %1718 = vmatmul.msk.bf16.vlgmr.msra.gmra.mxu3 %vm271_vm11, %v540_v51 }
 0x52b   :  { %1869 = vpow2.f32 %v494_v52 }
 0x52c   :  { %1871 = vpow2.f32 %v490_v27 }
 0x52d   :  { %v475_v55 = vpop.xlane.xlu1 %474 }
 0x52e   :  { %v483_v56 = vsub.f32 %v448_v22, %v475_v55 }
 0x530   :  { %v2161_v57 = vpop.eup %1867  ;;  %v498_v58 = vmul.f32 1.442695, %v483_v56 }
 0x531   :  { %v512_v59 = vsel %vm271_vm11, %v2161_v57, 0.0  ;;  %v2165_v60 = vpop.eup %1869 }
 0x532   :  { %1873 = vpow2.f32 %v498_v58  ;;  %513 = vadd.xlane.f32.xlu2 %v512_v59  ;;  %v515_v61 = vsel %vm271_vm11, %v2165_v60, 0.0  ;;  %v1872_v62 = vpop.eup %1871 }
 0x533   :  { %v509_v5 = vsel %vm271_vm11, %v1872_v62, 0.0 }
 0x536   :  { %516 = vadd.xlane.f32.xlu0 %v515_v61 }
 0x538   :  { %v1874_v63 = vpop.eup %1873  ;;  %v613_v0 = vpop.permute.xlu0 %612 }
 0x539   :  { %v618_v1 = vsel %vm553_vm12, %v613_v0, 0  ;;  %v521_v2 = vsel %vm271_vm11, %v1874_v63, 0.0 }
 0x53a   :  { %627 = vmatpush.bf16.msrb.mxu2 %v618_v1  ;;  %522 = vadd.xlane.f32.xlu1 %v521_v2 }
 0x53b   :  { %510 = vadd.xlane.f32.xlu2 %v509_v5 }
 0x545   :  { %v571_v6 = vpop.permute.xlu1 %570 }
 0x546   :  { %v576_v7 = vsel %vm553_vm12, %v571_v6, 0 }
 0x547   :  { %585 = vmatpush.bf16.msrb.mxu0 %v576_v7 }
 0x54a   :  { %696 = vrot.lane.b32.xlu0 %v2103_v35, %s2002_s20 }
 0x552   :  { %675 = vrot.lane.b32.xlu0 %v2113_v41, %s2002_s20 }
 0x553   :  { %633 = vrot.lane.b32.xlu1 %v2101_v34, %s2002_s20 }
 0x55b   :  { %751 = vrot.lane.b32.xlu1 %v2060_v3, %s2014_s4 }
 0x563   :  { %v472_v10 = vpop.xlane.xlu0 %471 }
 0x564   :  { %v482_v12 = vsub.f32 %v2139_v24, %v472_v10 }
 0x566   :  { %v496_v13 = vmul.f32 1.442695, %v482_v12 }
 0x568   :  { %1875 = vpow2.f32 %v496_v13 }
 0x56b   :  { %v505_v14 = vpop.xlane.xlu0 %504 }
 0x56c   :  { %1877 = vrcp.f32 %v505_v14 }
 0x56e   :  { %v1876_v15 = vpop.eup %1875 }
 0x56f   :  { %v518_v16 = vsel %vm271_vm11, %v1876_v15, 0.0 }
 0x570   :  { %519 = vadd.xlane.f32.xlu2 %v518_v16 }
 0x572   :  { %v1878_v17 = vpop.eup %1877 }
 0x573   :  { %v533_v35 = vmul.f32 %v1878_v17, %v2149_v33 }
 0x575   :  { %v541_v18 = vpack.c.bf16 %v533_v35, %v533_v35 }
 0x577   :  { %1719 = vmatmul.msk.bf16.vlgmr.msrb.gmra.mxu0 %vm271_vm11, %v541_v18  ;;  %v508_v41 = vpop.xlane.xlu1 %507 }
 0x578   :  { %1879 = vrcp.f32 %v508_v41 }
 0x57e   :  { %v1880_v34 = vpop.eup %1879  ;;  %v592_v20 = vpop.permute.xlu0 %591 }
 0x57f   :  { %v534_v22 = vmul.f32 %v1880_v34, %v2153_v39  ;;  %v597_v23 = vsel %vm553_vm12, %v592_v20, 0 }
 0x580   :  { %606 = vmatpush.bf16.msrb.mxu1 %v597_v23 }
 0x581   :  { %v542_v24 = vpack.c.bf16 %v534_v22, %v534_v22 }
 0x583   :  { %1720 = vmatmul.msk.bf16.vlgmr.msrb.gmra.mxu1 %vm271_vm11, %v542_v24 }
 0x588   :  { %654 = vrot.lane.b32.xlu2 %v2109_v38, %s2002_s20 }
 0x5a5   :  { %v514_v25 = vpop.xlane.xlu2 %513 }
 0x5a9   :  { %v517_v29 = vpop.xlane.xlu0 %516 }
 0x5ad   :  { %v2188_v26 = vpop.f32.mrf.mxu3  ;;  %v523_v36 = vpop.xlane.xlu1 %522 }
 0x5ae   :  { %v511_v28 = vpop.xlane.xlu2 %510 }
 0x5af   :  { %1881 = vrcp.f32 %v511_v28 }
 0x5b0   :  { %1883 = vrcp.f32 %v514_v25 }
 0x5b1   :  { %1885 = vrcp.f32 %v523_v36 }
 0x5b2   :  { %1887 = vrcp.f32 %v517_v29 }
 0x5b5   :  { %v1882_v31 = vpop.eup %1881  ;;  %v568_v32 = vpop.f32.mrf.mxu3 }
 0x5b6   :  { %v535_v33 = vmul.f32 %v1882_v31, %v1872_v62  ;;  %v1884_v38 = vpop.eup %1883  ;;  %v2222_v32 = vld [vmem:[#allocation4 + $0x4] ss:$0 sm:$0xff] }
 0x5b7   :  { %v1886_v39 = vpop.eup %1885  ;;  %v536_v21 = vmul.f32 %v1884_v38, %v2161_v57 }
 0x5b8   :  { %v543_v19 = vpack.c.bf16 %v535_v33, %v535_v33  ;;  %v539_v40 = vmul.f32 %v1886_v39, %v1874_v63  ;;  %v1888_v49 = vpop.eup %1887 }
 0x5b9   :  { %v544_v46 = vpack.c.bf16 %v536_v21, %v536_v21  ;;  %v537_v51 = vmul.f32 %v1888_v49, %v2165_v60  ;;  %v2017_v21 = vmov 32.0  }
 0x5ba   :  { %1721 = vmatmul.msk.bf16.vlgmr.msrb.gmra.mxu2 %vm271_vm11, %v543_v19  ;;  %v547_v47 = vpack.c.bf16 %v539_v40, %v539_v40 }
 0x5bb   :  { %v545_v55 = vpack.c.bf16 %v537_v51, %v537_v51 }
 0x5bc   :  { %v697_v37 = vpop.permute.xlu0 %696 }
 0x5bd   :  { %v702_v30 = vsel %vm553_vm12, %v697_v37, 0 }
 0x5be   :  { %711 = vmatpush.bf16.msra.mxu2 %v702_v30 }
 0x5c2   :  { %980 = vmatpush.bf16.msrb.mxu2 %v2060_v3 }
 0x5c4   :  { %v676_v42 = vpop.permute.xlu0 %675 }
 0x5c5   :  { %v681_v43 = vsel %vm553_vm12, %v676_v42, 0  ;;  %v634_v44 = vpop.permute.xlu1 %633 }
 0x5c6   :  { %981 = vmatpush.bf16.msrb.mxu2 %v2063_v4  ;;  %v639_v45 = vsel %vm553_vm12, %v634_v44, 0  ;;  %690 = vmatpush.bf16.msra.mxu1 %v681_v43 }
 0x5c7   :  { %648 = vmatpush.bf16.msrb.mxu3 %v639_v45 }
 0x5ca   :  { %1725 = vmatmul.msk.bf16.vlgmr.msra.gmra.mxu2 %vm271_vm11, %v547_v47  ;;  %1722 = vmatmul.msk.bf16.vlgmr.msrb.gmra.mxu3 %vm271_vm11, %v544_v46 }
 0x5cd   :  { %v2208_v13 = vpop.permute.xlu1 %751 }
 0x5ce   :  { %764 = vmatpush.bf16.msra.mxu3 %v2208_v13 }
 0x5e3   :  { %v520_v48 = vpop.xlane.xlu2 %519 }
 0x5e4   :  { %1889 = vrcp.f32 %v520_v48 }
 0x5e5   :  { %1891 = vrcp.f32 %v2017_v21 }
 0x5ea   :  { %v1890_v50 = vpop.eup %1889 }
 0x5eb   :  { %v538_v52 = vmul.f32 %v1890_v50, %v1876_v15  ;;  %v655_v53 = vpop.permute.xlu2 %654  ;;  %v1892_v40 = vpop.eup %1891 }
 0x5ec   :  { %v660_v54 = vsel %vm553_vm12, %v655_v53, 0  ;;  %v781_v42 = vmul.f32 32.0, %v1892_v40  ;;  %vm785_vm14 = vweird.f32 %v1892_v40 }
 0x5ed   :  { %v546_v27 = vpack.c.bf16 %v538_v52, %v538_v52  ;;  %669 = vmatpush.bf16.msra.mxu0 %v660_v54 }
 0x5ee   :  { %v782_v43 = vsub.f32 1.0, %v781_v42 }
 0x5ef   :  { %1724 = vmatmul.msk.bf16.vlgmr.msra.gmra.mxu1 %vm271_vm11, %v546_v27  ;;  %v2236_v27 = vld [vmem:[#allocation2 + $0x20] sm:$0xff] }
 0x5f0   :  { %1723 = vmatmul.msk.bf16.vlgmr.msra.gmra.mxu0 %vm271_vm11, %v545_v55  ;;  %v783_v44 = vmul.f32 %v1892_v40, %v782_v43 }
 0x5f1   :  { %851 = vmatpush.bf16.msrb.mxu0 %v2236_v27 }
 0x5f2   :  { %v784_v45 = vadd.f32 %v1892_v40, %v783_v44 }
 0x5f4   :  { %v587_v56 = vpop.f32.mrf.mxu0 }
 0x5fc   :  { %v589_v3 = vpop.f32.mrf.mxu0 }
 0x600   :  { %v608_v57 = vpop.f32.mrf.mxu1 }
 0x608   :  { %v610_v58 = vpop.f32.mrf.mxu1 }
 0x63d   :  { %v629_v59 = vpop.f32.mrf.mxu2 }
 0x63e   :  { %v1816_v61 = vpack.i.bf16 %v629_v59, %v608_v57  ;;  %v2240_v57 = vld [vmem:[#allocation2 + $0x18] sm:$0xff] }
 0x63f   :  { %852 = vmatpush.bf16.msrb.mxu0 %v2240_v57 }
 0x640   :  { %1817 = vrot.lane.b32.xlu2 %v1816_v61, %s2006_s1 }
 0x645   :  { %v631_v60 = vpop.f32.mrf.mxu2 }
 0x648   :  { %749 = vrot.lane.b32.xlu2 %v2063_v4, %s2014_s4 }
 0x64d   :  { %v713_v62 = vpop.f32.mrf.mxu2  ;;  %v650_v63 = vpop.f32.mrf.mxu3 }
 0x655   :  { %v715_v0 = vpop.f32.mrf.mxu2  ;;  %v652_v1 = vpop.f32.mrf.mxu3 }
 0x66c   :  { %v692_v2 = vpop.f32.mrf.mxu1 }
 0x66d   :  { %v1821_v5 = vpack.i.bf16 %v713_v62, %v692_v2  ;;  %v671_v6 = vpop.f32.mrf.mxu0 }
 0x66e   :  { %v1811_v7 = vpack.i.bf16 %v671_v6, %v650_v63 }
 0x66f   :  { %1822 = vrot.lane.b32.xlu1 %v1821_v5, %s2015_s5 }
 0x670   :  { %1812 = vrot.lane.b32.xlu0 %v1811_v7, %s2016_s6 }
 0x674   :  { %v694_v10 = vpop.f32.mrf.mxu1 }
 0x675   :  { %v673_v12 = vpop.f32.mrf.mxu0 }
 0x69a   :  { %v1818_v4 = vpop.permute.xlu2 %1817 }
 0x69b   :  { %v1820_v15 = vunpack.i.h.bf16 %v1818_v4  ;;  %v1819_v16 = vunpack.i.l.bf16 %v1818_v4 }
 0x69d   :  { %v742_v34 = vsel %vm271_vm11, %v587_v56, %v1820_v15  ;;  %v741_v20 = vsel %vm271_vm11, %v2188_v26, %v1819_v16  ;;  %v2244_v15 = vld [vmem:[#allocation4 + $0x5] ss:$0 sm:$0xff] }
 0x6a2   :  { %v2211_v14 = vpop.permute.xlu2 %749 }
 0x6a3   :  { %765 = vmatpush.bf16.msra.mxu3 %v2211_v14 }
 0x6e1   :  { %v1823_v17 = vpop.permute.xlu1 %1822 }
 0x6e2   :  { %v1813_v35 = vpop.permute.xlu0 %1812  ;;  %v1825_v22 = vunpack.i.h.bf16 %v1823_v17  ;;  %v1824_v23 = vunpack.i.l.bf16 %v1823_v17 }
 0x6e3   :  { %v1815_v18 = vunpack.i.h.bf16 %v1813_v35  ;;  %v1814_v41 = vunpack.i.l.bf16 %v1813_v35 }
 0x6e5   :  { %v743_v24 = vsel %vm109_vm0, %v741_v20, %v1814_v41  ;;  %v744_v25 = vsel %vm109_vm0, %v742_v34, %v1815_v18  ;;  %v2246_v18 = vld [vmem:[#allocation4 + $0x6] ss:$0 sm:$0xff] }
 0x6e6   :  { %v746_v28 = vsel %vm745_vm13, %v743_v24, %v1824_v23  ;;  %v747_v29 = vsel %vm745_vm13, %v744_v25, %v1825_v22  ;;  %v2253_v25 = vld [vmem:[#allocation2 + $0x40] sm:$0xff] }
 0x6e7   :  { %v748_v31 = vpack.c.bf16 %v747_v29, %v746_v28  ;;  %910 = vmatpush.bf16.msrb.mxu1 %v2253_v25  ;;  %v2256_v28 = vld [vmem:[#allocation2 + $0x38] sm:$0xff]  ;;  %v2259_v29 = vld [vmem:[#allocation2 + $0x30] sm:$0xff] }
 0x6e9   :  { %1726 = vmatmul.msk.bf16.vlgmr.msra.gmra.mxu3 %vm233_vm10, %v748_v31  ;;  %v2261_v31 = vld [vmem:[#allocation4 + $0x7] ss:$0 sm:$0xff] }
 0x6eb   :  { %911 = vmatpush.bf16.msrb.mxu1 %v2256_v28 }
 0x6ef   :  { %912 = vmatpush.bf16.msrb.mxu1 %v2259_v29 }
 0x76c   :  { %v767_v33 = vpop.f32.mrf.mxu3 }
 0x76d   :  { %v768_v36 = vadd.f32 %v2222_v32, %v767_v33 }
 0x76f   :  { %v772_v26 = vadd.f32 %v768_v36, %v2066_v8  ;;  %v2230_v8 = vsel %vm785_vm14, %v1892_v40, %v784_v45  ;;  %v2264_v36 = vld [vmem:[#allocation2 + $0x28] sm:$0xff] }
 0x770   :  { %913 = vmatpush.bf16.msrb.mxu1 %v2264_v36 }
 0x771   :  { %v774_v19 = vsel %vm233_vm10, %v772_v26, 0.0 }
 0x772   :  { %775 = vadd.xlane.f32.xlu0 %v774_v19 }
 0x774   :  { %v769_v37 = vpop.f32.mrf.mxu3 }
 0x775   :  { %v770_v30 = vadd.f32 %v2222_v32, %v769_v37 }
 0x777   :  { %v773_v38 = vadd.f32 %v770_v30, %v2068_v9 }
 0x779   :  { %v777_v39 = vsel %vm233_vm10, %v773_v38, 0.0 }
 0x77a   :  { %778 = vadd.xlane.f32.xlu1 %v777_v39 }
 0x7e5   :  { %v776_v46 = vpop.xlane.xlu0 %775 }
 0x7e6   :  { %v787_v47 = vmul.f32 %v2230_v8, %v776_v46 }
 0x7e8   :  { %v789_v48 = vsub.f32 %v772_v26, %v787_v47 }
 0x7ea   :  { %v791_v49 = vmul.f32 %v789_v48, %v789_v48 }
 0x7ec   :  { %v793_v9 = vsel %vm233_vm10, %v791_v49, 0.0 }
 0x7ed   :  { %v779_v50 = vpop.xlane.xlu1 %778  ;;  %794 = vadd.xlane.f32.xlu2 %v793_v9 }
 0x7ee   :  { %v788_v51 = vmul.f32 %v2230_v8, %v779_v50 }
 0x7f0   :  { %v790_v52 = vsub.f32 %v773_v38, %v788_v51 }
 0x7f2   :  { %v792_v53 = vmul.f32 %v790_v52, %v790_v52 }
 0x7f4   :  { %v796_v54 = vsel %vm233_vm10, %v792_v53, 0.0 }
 0x7f5   :  { %797 = vadd.xlane.f32.xlu0 %v796_v54 }
 0x860   :  { %v795_v55 = vpop.xlane.xlu2 %794 }
 0x861   :  { %v799_v56 = vmul.f32 %v795_v55, %v2230_v8  ;;  %v2270_v55 = vld [vmem:[#allocation4 + $0x8] ss:$0 sm:$0xff] }
 0x863   :  { %v801_v3 = vadd.f32 1e-12, %v799_v56 }
 0x865   :  { %1893 = vrsqrt.f32 %v801_v3  ;;  %vm809_vm1 = vweird.f32 %v801_v3 }
 0x868   :  { %v798_v58 = vpop.xlane.xlu0 %797 }
 0x869   :  { %v800_v59 = vmul.f32 %v798_v58, %v2230_v8 }
 0x86b   :  { %v1894_v61 = vpop.eup %1893  ;;  %v802_v60 = vadd.f32 1e-12, %v800_v59 }
 0x86c   :  { %v804_v62 = vmul.f32 %v1894_v61, %v801_v3  ;;  %vm810_vm15 = vweird.f32 %v1894_v61 }
 0x86d   :  { %1895 = vrsqrt.f32 %v802_v60  ;;  %vm811_vm2 = vmor %vm809_vm1, %vm810_vm15  ;;  %vm819_vm4 = vweird.f32 %v802_v60 }
 0x86e   :  { %v805_v63 = vmul.f32 %v1894_v61, %v804_v62 }
 0x870   :  { %v806_v0 = vmul.f32 0.5, %v805_v63 }
 0x872   :  { %v807_v1 = vsub.f32 1.5, %v806_v0 }
 0x873   :  { %v1896_v2 = vpop.eup %1895 }
 0x874   :  { %v808_v5 = vmul.f32 %v1894_v61, %v807_v1  ;;  %v814_v6 = vmul.f32 %v1896_v2, %v802_v60  ;;  %vm820_vm3 = vweird.f32 %v1896_v2 }
 0x875   :  { %vm821_vm5 = vmor %vm819_vm4, %vm820_vm3 }
 0x876   :  { %v815_v7 = vmul.f32 %v1896_v2, %v814_v6  ;;  %v812_v10 = vsel %vm811_vm2, %v1894_v61, %v808_v5 }
 0x877   :  { %v823_v16 = vmul.f32 %v812_v10, %v789_v48 }
 0x878   :  { %v816_v12 = vmul.f32 0.5, %v815_v7 }
 0x879   :  { %v825_v41 = vmul.f32 %v2244_v15, %v823_v16 }
 0x87a   :  { %v817_v4 = vsub.f32 1.5, %v816_v12 }
 0x87b   :  { %v827_v22 = vadd.f32 %v2246_v18, %v825_v41 }
 0x87c   :  { %v818_v17 = vmul.f32 %v1896_v2, %v817_v4 }
 0x87e   :  { %v822_v35 = vsel %vm821_vm5, %v1896_v2, %v818_v17 }
 0x87f   :  { %v824_v34 = vmul.f32 %v822_v35, %v790_v52 }
 0x881   :  { %v826_v20 = vmul.f32 %v2244_v15, %v824_v34 }
 0x883   :  { %v828_v23 = vadd.f32 %v2246_v18, %v826_v20 }
 0x885   :  { %v829_v24 = vpack.c.bf16 %v828_v23, %v827_v22 }
 0x887   :  { %1735 = vmatmul.msk.bf16.vlgmr.msrb.gmra.mxu0 %vm233_vm10, %v829_v24 }
 0x904   :  { %v854_v33 = vpop.f32.mrf.mxu0 }
 0x905   :  { %v855_v26 = vadd.f32 %v2261_v31, %v854_v33 }
 0x907   :  { %v859_v19 = vmul.f32 %v855_v26, %v855_v26 }
 0x909   :  { %v861_v37 = vmul.f32 %v859_v19, %v855_v26 }
 0x90b   :  { %v863_v30 = vmul.f32 0.044715, %v861_v37 }
 0x90c   :  { %v856_v38 = vpop.f32.mrf.mxu0 }
 0x90d   :  { %v865_v39 = vadd.f32 %v863_v30, %v855_v26  ;;  %v857_v21 = vadd.f32 %v2261_v31, %v856_v38 }
 0x90f   :  { %v867_v40 = vmul.f32 0.7978846, %v865_v39  ;;  %v860_v42 = vmul.f32 %v857_v21, %v857_v21 }
 0x911   :  { %v862_v43 = vmul.f32 %v860_v42, %v857_v21  ;;  %1897 = vtanh.f32 %v867_v40 }
 0x913   :  { %v864_v44 = vmul.f32 0.044715, %v862_v43  ;;  %v2282_v43 = vld [vmem:[#allocation4 + $0x9] ss:$0 sm:$0xff] }
 0x915   :  { %v866_v45 = vadd.f32 %v864_v44, %v857_v21 }
 0x917   :  { %v868_v46 = vmul.f32 0.7978846, %v866_v45  ;;  %v1898_v47 = vpop.eup %1897 }
 0x918   :  { %v871_v48 = vadd.f32 1.0, %v1898_v47  ;;  %v2284_v47 = vld [vmem:[#allocation4 + $0xa] ss:$0 sm:$0xff] }
 0x919   :  { %1899 = vtanh.f32 %v868_v46 }
 0x91a   :  { %v873_v9 = vmul.f32 0.5, %v871_v48 }
 0x91c   :  { %v875_v52 = vmul.f32 %v873_v9, %v855_v26 }
 0x91f   :  { %v1900_v49 = vpop.eup %1899 }
 0x920   :  { %v872_v50 = vadd.f32 1.0, %v1900_v49 }
 0x922   :  { %v874_v51 = vmul.f32 0.5, %v872_v50 }
 0x924   :  { %v876_v53 = vmul.f32 %v874_v51, %v857_v21 }
 0x926   :  { %v877_v54 = vpack.c.bf16 %v876_v53, %v875_v52 }
 0x928   :  { %1752 = vmatmul.msk.bf16.vlgmr.msrb.gmra.mxu1 %vm902_vm6, %v877_v54 }
 0x9a5   :  { %v915_v56 = vpop.f32.mrf.mxu1 }
 0x9a6   :  { %v916_v3 = vadd.f32 %v2270_v55, %v915_v56 }
 0x9a8   :  { %v920_v58 = vadd.f32 %v916_v3, %v827_v22 }
 0x9aa   :  { %v922_v59 = vsel %vm233_vm10, %v920_v58, 0.0 }
 0x9ab   :  { %923 = vadd.xlane.f32.xlu1 %v922_v59 }
 0x9ad   :  { %v917_v61 = vpop.f32.mrf.mxu1 }
 0x9ae   :  { %v918_v60 = vadd.f32 %v2270_v55, %v917_v61 }
 0x9b0   :  { %v921_v62 = vadd.f32 %v918_v60, %v828_v23 }
 0x9b2   :  { %v925_v63 = vsel %vm233_vm10, %v921_v62, 0.0 }
 0x9b3   :  { %926 = vadd.xlane.f32.xlu2 %v925_v63 }
 0xa1e   :  { %v924_v0 = vpop.xlane.xlu1 %923 }
 0xa1f   :  { %v928_v1 = vmul.f32 %v924_v0, %v2230_v8 }
 0xa21   :  { %v930_v2 = vsub.f32 %v920_v58, %v928_v1 }
 0xa23   :  { %v932_v5 = vmul.f32 %v930_v2, %v930_v2 }
 0xa25   :  { %v934_v6 = vsel %vm233_vm10, %v932_v5, 0.0 }
 0xa26   :  { %v927_v7 = vpop.xlane.xlu2 %926  ;;  %935 = vadd.xlane.f32.xlu0 %v934_v6 }
 0xa27   :  { %v929_v10 = vmul.f32 %v927_v7, %v2230_v8 }
 0xa29   :  { %v931_v12 = vsub.f32 %v921_v62, %v929_v10 }
 0xa2b   :  { %v933_v4 = vmul.f32 %v931_v12, %v931_v12 }
 0xa2d   :  { %v937_v16 = vsel %vm233_vm10, %v933_v4, 0.0 }
 0xa2e   :  { %938 = vadd.xlane.f32.xlu1 %v937_v16 }
 0xa99   :  { %v936_v17 = vpop.xlane.xlu0 %935 }
 0xa9a   :  { %v940_v35 = vmul.f32 %v936_v17, %v2230_v8 }
 0xa9c   :  { %v942_v41 = vadd.f32 1e-12, %v940_v35 }
 0xa9e   :  { %1901 = vrsqrt.f32 %v942_v41  ;;  %vm950_vm8 = vweird.f32 %v942_v41 }
 0xaa1   :  { %v939_v34 = vpop.xlane.xlu1 %938 }
 0xaa2   :  { %v941_v20 = vmul.f32 %v939_v34, %v2230_v8 }
 0xaa4   :  { %v1902_v22 = vpop.eup %1901  ;;  %v943_v23 = vadd.f32 1e-12, %v941_v20 }
 0xaa5   :  { %v945_v24 = vmul.f32 %v1902_v22, %v942_v41  ;;  %vm951_vm7 = vweird.f32 %v1902_v22 }
 0xaa6   :  { %1903 = vrsqrt.f32 %v943_v23  ;;  %vm952_vm9 = vmor %vm950_vm8, %vm951_vm7  ;;  %vm960_vm15 = vweird.f32 %v943_v23 }
 0xaa7   :  { %v946_v33 = vmul.f32 %v1902_v22, %v945_v24 }
 0xaa9   :  { %v947_v26 = vmul.f32 0.5, %v946_v33 }
 0xaab   :  { %v948_v19 = vsub.f32 1.5, %v947_v26 }
 0xaac   :  { %v1904_v37 = vpop.eup %1903 }
 0xaad   :  { %v949_v30 = vmul.f32 %v1902_v22, %v948_v19  ;;  %v955_v38 = vmul.f32 %v1904_v37, %v943_v23  ;;  %vm961_vm14 = vweird.f32 %v1904_v37 }
 0xaae   :  { %vm962_vm1 = vmor %vm960_vm15, %vm961_vm14 }
 0xaaf   :  { %v956_v39 = vmul.f32 %v1904_v37, %v955_v38  ;;  %v953_v21 = vsel %vm952_vm9, %v1902_v22, %v949_v30 }
 0xab0   :  { %v964_v44 = vmul.f32 %v953_v21, %v930_v2 }
 0xab1   :  { %v957_v40 = vmul.f32 0.5, %v956_v39 }
 0xab2   :  { %v966_v48 = vmul.f32 %v2282_v43, %v964_v44 }
 0xab3   :  { %v958_v42 = vsub.f32 1.5, %v957_v40 }
 0xab4   :  { %v2289_v50 = vadd.f32 %v2284_v47, %v966_v48 }
 0xab5   :  { %v959_v45 = vmul.f32 %v1904_v37, %v958_v42 }
 0xab7   :  { %v963_v46 = vsel %vm962_vm1, %v1904_v37, %v959_v45 }
 0xab8   :  { %v965_v49 = vmul.f32 %v963_v46, %v931_v12 }
 0xaba   :  { %v967_v9 = vmul.f32 %v2282_v43, %v965_v49 }
 0xabc   :  { %v2292_v51 = vadd.f32 %v2284_v47, %v967_v9 }
 0xabe   :  { %v970_v52 = vpack.c.bf16 %v2292_v51, %v2289_v50 }
 0xac0   :  { %1753 = vmatmul.msk.bf16.vlgmr.msrb.gmra.mxu2 %vm233_vm10, %v970_v52 }
 0xb43   :  { %v983_v53 = vpop.f32.mrf.mxu2 }
 0xb44   :  { %v984_v54 = vadd.f32 %v2073_v11, %v983_v53 }
 0xb46   :  { %v988_v56 = vpack.c.bf16 %v984_v54, %v984_v54 }
 0xb48   :  { %996 = vrot.lane.b32.xlu1 %v988_v56, %s2010_s0  ;;  %992 = vrot.lane.b32.xlu0 %v988_v56, %s2011_s28  ;;  %v1004_v58 = vunpack.c.l.b16 %v988_v56 }
 0xb4a   :  { %v1005_v60 = vpack.c.b16 %v1004_v58, %v1004_v58 }
 0xb4b   :  { %v985_v3 = vpop.f32.mrf.mxu2 }
 0xb4c   :  { %v986_v59 = vadd.f32 %v2073_v11, %v985_v3 }
 0xb4e   :  { %v989_v61 = vpack.c.bf16 %v986_v59, %v986_v59 }
 0xb50   :  { %994 = vrot.lane.b32.xlu2 %v989_v61, %s2011_s28  ;;  %1002 = vrot.lane.b32.xlu0 %v989_v61, %s2013_s30  ;;  %v1027_v62 = vunpack.c.l.b16 %v989_v61 }
 0xb51   :  { %1006 = vrot.lane.b32.xlu1 %v1005_v60, %s2012_s29 }
 0xb52   :  { %v2306_v63 = vpack.c.b16 %v1027_v62, %v1027_v62 }
 0xb58   :  { %998 = vrot.lane.b32.xlu2 %v989_v61, %s2010_s0  ;;  %1000 = vrot.lane.b32.xlu0 %v988_v56, %s2013_s30 }
 0xb60   :  { %1029 = vrot.lane.b32.xlu0 %v2306_v63, %s2012_s29 }
 0xbaa   :  { %v995_v0 = vpop.permute.xlu2 %994 }
 0xbab   :  { %v1073_v11 = vunpack.c.l.b16 %v995_v0 }
 0xbad   :  { %v2310_v1 = vpack.c.b16 %v1073_v11, %v1073_v11 }
 0xbaf   :  { %1075 = vrot.lane.b32.xlu2 %v2310_v1, %s2012_s29 }
 0xbb2   :  { %v999_v4 = vpop.permute.xlu2 %998 }
 0xbb3   :  { %v1119_v16 = vunpack.c.l.b16 %v999_v4 }
 0xbb5   :  { %v2323_v20 = vpack.c.b16 %v1119_v16, %v1119_v16 }
 0xbba   :  { %v997_v2 = vpop.permute.xlu1 %996  ;;  %v993_v5 = vpop.permute.xlu0 %992 }
 0xbbb   :  { %v1096_v6 = vunpack.c.l.b16 %v997_v2  ;;  %v1050_v7 = vunpack.c.l.b16 %v993_v5 }
 0xbbd   :  { %v2314_v10 = vpack.c.b16 %v1096_v6, %v1096_v6  ;;  %v2316_v12 = vpack.c.b16 %v1050_v7, %v1050_v7 }
 0xbbf   :  { %1098 = vrot.lane.b32.xlu2 %v2314_v10, %s2012_s29  ;;  %1052 = vrot.lane.b32.xlu1 %v2316_v12, %s2012_s29 }
 0xbc2   :  { %v1003_v17 = vpop.permute.xlu0 %1002 }
 0xbc3   :  { %v1165_v35 = vunpack.c.l.b16 %v1003_v17  ;;  %v1007_v41 = vpop.permute.xlu1 %1006 }
 0xbc4   :  { %v1012_v34 = vsel %vm271_vm11, %v1007_v41, 0 }
 0xbc5   :  { %v2325_v22 = vpack.c.b16 %v1165_v35, %v1165_v35  ;;  %1021 = vmatpush.bf16.xpose.msrb.mxu3 %v1012_v34 }
 0xbc7   :  { %1167 = vrot.lane.b32.xlu0 %v2325_v22, %s2012_s29  ;;  %1121 = vrot.lane.b32.xlu1 %v2323_v20, %s2012_s29 }
 0xbca   :  { %v1001_v23 = vpop.permute.xlu0 %1000 }
 0xbcb   :  { %v1142_v24 = vunpack.c.l.b16 %v1001_v23 }
 0xbcc   :  { %1754 = vmatmul.msk.bf16.vlgmr.msrb.gmra.mxu3 %vm271_vm11, %v988_v56 }
 0xbcd   :  { %v2332_v33 = vpack.c.b16 %v1142_v24, %v1142_v24 }
 0xbcf   :  { %1144 = vrot.lane.b32.xlu2 %v2332_v33, %s2012_s29  ;;  %1284 = vrot.lane.b32.xlu0 %v1005_v60, %s2002_s20 }
 0xbd2   :  { %v1030_v26 = vpop.permute.xlu0 %1029 }
 0xbd3   :  { %v1035_v19 = vsel %vm271_vm11, %v1030_v26, 0 }
 0xbd4   :  { %1044 = vmatpush.bf16.xpose.msra.mxu0 %v1035_v19 }
 0xbdb   :  { %1755 = vmatmul.msk.bf16.vlgmr.msra.gmra.mxu0 %vm271_vm11, %v989_v61 }
 0xc09   :  { %v1076_v37 = vpop.permute.xlu2 %1075 }
 0xc0a   :  { %v1081_v30 = vsel %vm271_vm11, %v1076_v37, 0 }
 0xc0b   :  { %1090 = vmatpush.bf16.xpose.msra.mxu2 %v1081_v30 }
 0xc12   :  { %1757 = vmatmul.msk.bf16.vlgmr.msra.gmra.mxu2 %vm271_vm11, %v995_v0 }
 0xc19   :  { %v1099_v38 = vpop.permute.xlu2 %1098 }
 0xc1a   :  { %v1104_v39 = vsel %vm271_vm11, %v1099_v38, 0 }
 0xc1b   :  { %1113 = vmatpush.bf16.xpose.msra.mxu3 %v1104_v39 }
 0xc22   :  { %1758 = vmatmul.msk.bf16.vlgmr.msra.gmra.mxu3 %vm271_vm11, %v997_v2 }
 0xc29   :  { %v1145_v21 = vpop.permute.xlu2 %1144 }
 0xc2a   :  { %v1150_v44 = vsel %vm271_vm11, %v1145_v21, 0 }
 0xc31   :  { %v1053_v40 = vpop.permute.xlu1 %1052 }
 0xc32   :  { %v1058_v42 = vsel %vm271_vm11, %v1053_v40, 0 }
 0xc33   :  { %1067 = vmatpush.bf16.xpose.msra.mxu1 %v1058_v42 }
 0xc39   :  { %v1168_v45 = vpop.permute.xlu0 %1167  ;;  %v1122_v46 = vpop.permute.xlu1 %1121 }
 0xc3a   :  { %v1173_v48 = vsel %vm271_vm11, %v1168_v45, 0  ;;  %v1127_v49 = vsel %vm271_vm11, %v1122_v46, 0  ;;  %1756 = vmatmul.msk.bf16.vlgmr.msra.gmra.mxu1 %vm271_vm11, %v993_v5 }
 0xc3b   :  { %1159 = vmatpush.bf16.xpose.msrb.mxu1 %v1150_v44  ;;  %1136 = vmatpush.bf16.xpose.msrb.mxu0 %v1127_v49 }
 0xc3c   :  { %1182 = vmatpush.bf16.xpose.msrb.mxu2 %v1173_v48 }
 0xc41   :  { %v1285_v9 = vpop.permute.xlu0 %1284 }
 0xc42   :  { %v1290_v52 = vsel %vm553_vm12, %v1285_v9, 0  ;;  %1759 = vmatmul.msk.bf16.vlgmr.msrb.gmra.mxu0 %vm271_vm11, %v999_v4 }
 0xc43   :  { %1761 = vmatmul.msk.bf16.vlgmr.msrb.gmra.mxu2 %vm271_vm11, %v1003_v17  ;;  %1299 = vmatpush.bf16.msrb.mxu3 %v1290_v52 }
 0xc4a   :  { %1760 = vmatmul.msk.bf16.vlgmr.msrb.gmra.mxu1 %vm271_vm11, %v1001_v23 }
 0xc4f   :  { %v1023_v53 = vpop.f32.mrf.mxu3 }
 0xc50   :  { %v1188_v54 = vsel %vm271_vm11, %v1023_v53, -inf }
 0xc51   :  { %1189 = vmax.xlane.f32.xlu0 %v1188_v54 }
 0xc57   :  { %v1025_v56 = vpop.f32.mrf.mxu3 }
 0xc58   :  { %v1046_v3 = vpop.f32.mrf.mxu0 }
 0xc59   :  { %v1191_v58 = vsel %vm271_vm11, %v1046_v3, -inf }
 0xc5a   :  { %1192 = vmax.xlane.f32.xlu2 %v1191_v58 }
 0xc60   :  { %v1048_v59 = vpop.f32.mrf.mxu0 }
 0xc72   :  { %1305 = vrot.lane.b32.xlu2 %v2306_v63, %s2002_s20 }
 0xc95   :  { %v1092_v61 = vpop.f32.mrf.mxu2 }
 0xc96   :  { %v1197_v2 = vsel %vm271_vm11, %v1092_v61, -inf }
 0xc9d   :  { %v1094_v60 = vpop.f32.mrf.mxu2 }
 0xca5   :  { %v1115_v62 = vpop.f32.mrf.mxu3 }
 0xca6   :  { %v1200_v0 = vsel %vm271_vm11, %v1115_v62, -inf }
 0xca7   :  { %1201 = vmax.xlane.f32.xlu1 %v1200_v0 }
 0xcad   :  { %v1117_v11 = vpop.f32.mrf.mxu3 }
 0xcaf   :  { %1198 = vmax.xlane.f32.xlu1 %v1197_v2 }
 0xcb7   :  { %v1069_v5 = vpop.f32.mrf.mxu1 }
 0xcb8   :  { %v1194_v6 = vsel %vm271_vm11, %v1069_v5, -inf }
 0xcb9   :  { %1195 = vmax.xlane.f32.xlu0 %v1194_v6 }
 0xcbf   :  { %v1071_v7 = vpop.f32.mrf.mxu1  ;;  %v1138_v4 = vpop.f32.mrf.mxu0 }
 0xcc0   :  { %v1203_v16 = vsel %vm271_vm11, %v1138_v4, -inf }
 0xcc1   :  { %1204 = vmax.xlane.f32.xlu0 %v1203_v16 }
 0xcc4   :  { %v1190_v63 = vpop.xlane.xlu0 %1189 }
 0xcc5   :  { %v1212_v17 = vsub.f32 %v1023_v53, %v1190_v63 }
 0xcc6   :  { %v2360_v35 = vpop.f32.mrf.mxu2 }
 0xcc7   :  { %v1220_v41 = vmul.f32 1.442695, %v1212_v17  ;;  %v1140_v34 = vpop.f32.mrf.mxu0  ;;  %v2362_v23 = vpop.f32.mrf.mxu1  ;;  %v1209_v21 = vsel %vm271_vm11, %v2360_v35, -inf }
 0xcc8   :  { %1347 = vrot.lane.b32.xlu1 %v2310_v1, %s2002_s20  ;;  %v1206_v42 = vsel %vm271_vm11, %v2362_v23, -inf }
 0xcc9   :  { %1905 = vpow2.f32 %v1220_v41 }
 0xccd   :  { %v1193_v24 = vpop.xlane.xlu2 %1192 }
 0xcce   :  { %v1186_v26 = vpop.f32.mrf.mxu2  ;;  %v1213_v1 = vsub.f32 %v1046_v3, %v1193_v24 }
 0xccf   :  { %v1906_v19 = vpop.eup %1905  ;;  %v1163_v37 = vpop.f32.mrf.mxu1 }
 0xcd0   :  { %v1236_v30 = vsel %vm271_vm11, %v1906_v19, 0.0  ;;  %v1222_v40 = vmul.f32 1.442695, %v1213_v1 }
 0xcd1   :  { %1237 = vadd.xlane.f32.xlu2 %v1236_v30 }
 0xcd2   :  { %1907 = vpow2.f32 %v1222_v40 }
 0xcd5   :  { %v1306_v38 = vpop.permute.xlu2 %1305  ;;  %1326 = vrot.lane.b32.xlu0 %v2316_v12, %s2002_s20 }
 0xcd6   :  { %v1311_v39 = vsel %vm553_vm12, %v1306_v38, 0 }
 0xcd7   :  { %1320 = vmatpush.bf16.msra.mxu0 %v1311_v39 }
 0xcd8   :  { %v2374_v44 = vpop.eup %1907 }
 0xcd9   :  { %1210 = vmax.xlane.f32.xlu2 %v1209_v21  ;;  %v1239_v45 = vsel %vm271_vm11, %v2374_v44, 0.0 }
 0xcf2   :  { %1207 = vmax.xlane.f32.xlu1 %v1206_v42 }
 0xcfa   :  { %1240 = vadd.xlane.f32.xlu1 %v1239_v45 }
 0xd1a   :  { %v1202_v12 = vpop.xlane.xlu1 %1201 }
 0xd1b   :  { %v1216_v49 = vsub.f32 %v1115_v62, %v1202_v12 }
 0xd1d   :  { %v1228_v53 = vmul.f32 1.442695, %v1216_v49 }
 0xd22   :  { %v1199_v52 = vpop.xlane.xlu1 %1198 }
 0xd23   :  { %v1215_v58 = vsub.f32 %v1092_v61, %v1199_v52 }
 0xd25   :  { %v1226_v11 = vmul.f32 1.442695, %v1215_v58 }
 0xd2c   :  { %v1196_v46 = vpop.xlane.xlu0 %1195 }
 0xd2d   :  { %v1214_v48 = vsub.f32 %v1069_v5, %v1196_v46 }
 0xd2f   :  { %v1224_v9 = vmul.f32 1.442695, %v1214_v48 }
 0xd31   :  { %1909 = vpow2.f32 %v1224_v9 }
 0xd32   :  { %1911 = vpow2.f32 %v1228_v53 }
 0xd34   :  { %v1205_v54 = vpop.xlane.xlu0 %1204 }
 0xd35   :  { %v1217_v56 = vsub.f32 %v1138_v4, %v1205_v54 }
 0xd37   :  { %v1910_v3 = vpop.eup %1909  ;;  %v1230_v59 = vmul.f32 1.442695, %v1217_v56 }
 0xd38   :  { %v1242_v60 = vsel %vm271_vm11, %v1910_v3, 0.0  ;;  %v2380_v62 = vpop.eup %1911 }
 0xd39   :  { %1913 = vpow2.f32 %v1230_v59  ;;  %1243 = vadd.xlane.f32.xlu2 %v1242_v60  ;;  %v1248_v61 = vsel %vm271_vm11, %v2380_v62, 0.0 }
 0xd3a   :  { %v1348_v0 = vpop.permute.xlu1 %1347  ;;  %1915 = vpow2.f32 %v1226_v11 }
 0xd3b   :  { %v1353_v2 = vsel %vm553_vm12, %v1348_v0, 0 }
 0xd3c   :  { %1362 = vmatpush.bf16.msra.mxu2 %v1353_v2 }
 0xd3f   :  { %v2382_v5 = vpop.eup %1913 }
 0xd40   :  { %v1251_v6 = vsel %vm271_vm11, %v2382_v5, 0.0  ;;  %v1916_v4 = vpop.eup %1915 }
 0xd41   :  { %1252 = vadd.xlane.f32.xlu0 %v1251_v6  ;;  %1249 = vadd.xlane.f32.xlu2 %v1248_v61  ;;  %v1245_v17 = vsel %vm271_vm11, %v1916_v4, 0.0 }
 0xd44   :  { %v1238_v7 = vpop.xlane.xlu2 %1237 }
 0xd45   :  { %1917 = vrcp.f32 %v1238_v7 }
 0xd47   :  { %v1327_v16 = vpop.permute.xlu0 %1326 }
 0xd48   :  { %v1332_v63 = vsel %vm553_vm12, %v1327_v16, 0 }
 0xd49   :  { %1341 = vmatpush.bf16.msra.mxu1 %v1332_v63  ;;  %1246 = vadd.xlane.f32.xlu0 %v1245_v17 }
 0xd4b   :  { %v1918_v41 = vpop.eup %1917 }
 0xd4c   :  { %v1268_v34 = vmul.f32 %v1918_v41, %v1906_v19  ;;  %v1211_v24 = vpop.xlane.xlu2 %1210 }
 0xd4d   :  { %v1219_v26 = vsub.f32 %v2360_v35, %v1211_v24 }
 0xd4e   :  { %v1276_v37 = vpack.c.bf16 %v1268_v34, %v1268_v34 }
 0xd4f   :  { %v1234_v30 = vmul.f32 1.442695, %v1219_v26 }
 0xd50   :  { %1762 = vmatmul.msk.bf16.vlgmr.msrb.gmra.mxu3 %vm271_vm11, %v1276_v37 }
 0xd51   :  { %1919 = vpow2.f32 %v1234_v30 }
 0xd57   :  { %v1920_v38 = vpop.eup %1919 }
 0xd58   :  { %v1257_v39 = vsel %vm271_vm11, %v1920_v38, 0.0 }
 0xd59   :  { %1258 = vadd.xlane.f32.xlu1 %v1257_v39 }
 0xd5d   :  { %1431 = vrot.lane.b32.xlu0 %v2325_v22, %s2002_s20 }
 0xd65   :  { %1410 = vrot.lane.b32.xlu0 %v2332_v33, %s2002_s20  ;;  %v1208_v21 = vpop.xlane.xlu1 %1207 }
 0xd66   :  { %v1218_v19 = vsub.f32 %v2362_v23, %v1208_v21 }
 0xd68   :  { %v1232_v1 = vmul.f32 1.442695, %v1218_v19 }
 0xd6a   :  { %1921 = vpow2.f32 %v1232_v1 }
 0xd6d   :  { %v1241_v35 = vpop.xlane.xlu1 %1240 }
 0xd6e   :  { %1923 = vrcp.f32 %v1241_v35 }
 0xd70   :  { %v1922_v40 = vpop.eup %1921 }
 0xd71   :  { %v1254_v42 = vsel %vm271_vm11, %v1922_v40, 0.0 }
 0xd72   :  { %1368 = vrot.lane.b32.xlu1 %v2314_v10, %s2002_s20  ;;  %1255 = vadd.xlane.f32.xlu2 %v1254_v42 }
 0xd74   :  { %v1924_v45 = vpop.eup %1923 }
 0xd75   :  { %v1269_v22 = vmul.f32 %v1924_v45, %v2374_v44 }
 0xd77   :  { %v1277_v12 = vpack.c.bf16 %v1269_v22, %v1269_v22 }
 0xd79   :  { %1763 = vmatmul.msk.bf16.vlgmr.msra.gmra.mxu0 %vm271_vm11, %v1277_v12 }
 0xd8a   :  { %1389 = vrot.lane.b32.xlu2 %v2323_v20, %s2002_s20 }
 0xdac   :  { %v1244_v33 = vpop.xlane.xlu2 %1243 }
 0xdad   :  { %1925 = vrcp.f32 %v1244_v33 }
 0xdb3   :  { %v1926_v23 = vpop.eup %1925 }
 0xdb4   :  { %v1270_v46 = vmul.f32 %v1926_v23, %v1910_v3  ;;  %v1253_v48 = vpop.xlane.xlu0 %1252  ;;  %v1250_v60 = vpop.xlane.xlu2 %1249 }
 0xdb6   :  { %v1278_v49 = vpack.c.bf16 %v1270_v46, %v1270_v46 }
 0xdb8   :  { %1764 = vmatmul.msk.bf16.vlgmr.msra.gmra.mxu1 %vm271_vm11, %v1278_v49 }
 0xdbc   :  { %v1247_v9 = vpop.xlane.xlu0 %1246 }
 0xdbd   :  { %1927 = vrcp.f32 %v1247_v9 }
 0xdc3   :  { %v1928_v10 = vpop.eup %1927 }
 0xdc4   :  { %v1271_v52 = vmul.f32 %v1928_v10, %v1916_v4 }
 0xdc6   :  { %v1279_v53 = vpack.c.bf16 %v1271_v52, %v1271_v52 }
 0xdc8   :  { %1765 = vmatmul.msk.bf16.vlgmr.msra.gmra.mxu2 %vm271_vm11, %v1279_v53 }
 0xdcc   :  { %v1259_v44 = vpop.xlane.xlu1 %1258 }
 0xdcd   :  { %1929 = vrcp.f32 %v1259_v44 }
 0xdce   :  { %1931 = vrcp.f32 %v1250_v60 }
 0xdcf   :  { %v1432_v54 = vpop.permute.xlu0 %1431  ;;  %1933 = vrcp.f32 %v1253_v48 }
 0xdd0   :  { %v1437_v20 = vsel %vm553_vm12, %v1432_v54, 0 }
 0xdd1   :  { %1446 = vmatpush.bf16.msrb.mxu2 %v1437_v20 }
 0xdd3   :  { %v1930_v56 = vpop.eup %1929  ;;  %v2408_v58 = vpop.f32.mrf.mxu3 }
 0xdd4   :  { %v1275_v3 = vmul.f32 %v1930_v56, %v1920_v38  ;;  %v1932_v6 = vpop.eup %1931 }
 0xdd5   :  { %v1272_v61 = vmul.f32 %v1932_v6, %v2380_v62 }
 0xdd6   :  { %v1283_v59 = vpack.c.bf16 %v1275_v3, %v1275_v3 }
 0xdd7   :  { %v1411_v0 = vpop.permute.xlu0 %1410  ;;  %v1280_v63 = vpack.c.bf16 %v1272_v61, %v1272_v61 }
 0xdd8   :  { %v1416_v11 = vsel %vm553_vm12, %v1411_v0, 0  ;;  %1769 = vmatmul.msk.bf16.vlgmr.msrb.gmra.mxu2 %vm271_vm11, %v1283_v59 }
 0xdd9   :  { %1425 = vmatpush.bf16.msrb.mxu1 %v1416_v11 }
 0xddb   :  { %v1303_v2 = vpop.f32.mrf.mxu3 }
 0xddd   :  { %1594 = vmatpush.bf16.msra.mxu1 %v2253_v25  ;;  %v1934_v25 = vpop.eup %1933 }
 0xde1   :  { %1595 = vmatpush.bf16.msra.mxu1 %v2256_v28 }
 0xde4   :  { %v1369_v7 = vpop.permute.xlu1 %1368 }
 0xde5   :  { %1596 = vmatpush.bf16.msra.mxu1 %v2259_v29  ;;  %v1374_v4 = vsel %vm553_vm12, %v1369_v7, 0  ;;  %v1256_v16 = vpop.xlane.xlu2 %1255  ;;  %v1273_v29 = vmul.f32 %v1934_v25, %v2382_v5 }
 0xde6   :  { %1935 = vrcp.f32 %v1256_v16  ;;  %1383 = vmatpush.bf16.msra.mxu3 %v1374_v4 }
 0xde7   :  { %v1281_v24 = vpack.c.bf16 %v1273_v29, %v1273_v29 }
 0xde9   :  { %1597 = vmatpush.bf16.msra.mxu1 %v2264_v36  ;;  %1766 = vmatmul.msk.bf16.vlgmr.msra.gmra.mxu3 %vm271_vm11, %v1280_v63 }
 0xdea   :  { %1492 = vmatpush.bf16.msrb.mxu3 %v2208_v13 }
 0xdec   :  { %v1936_v28 = vpop.eup %1935 }
 0xded   :  { %v1274_v62 = vmul.f32 %v1936_v28, %v1922_v40  ;;  %v1390_v17 = vpop.permute.xlu2 %1389 }
 0xdee   :  { %1493 = vmatpush.bf16.msrb.mxu3 %v2211_v14  ;;  %v1395_v41 = vsel %vm553_vm12, %v1390_v17, 0 }
 0xdef   :  { %v1282_v34 = vpack.c.bf16 %v1274_v62, %v1274_v62  ;;  %1404 = vmatpush.bf16.msrb.mxu0 %v1395_v41 }
 0xdf1   :  { %1768 = vmatmul.msk.bf16.vlgmr.msrb.gmra.mxu1 %vm271_vm11, %v1282_v34 }
 0xdf2   :  { %1767 = vmatmul.msk.bf16.vlgmr.msrb.gmra.mxu0 %vm271_vm11, %v1281_v24 }
 0xdf3   :  { %1560 = vmatpush.bf16.msra.mxu0 %v2236_v27 }
 0xdf6   :  { %v1322_v13 = vpop.f32.mrf.mxu0 }
 0xdf7   :  { %1561 = vmatpush.bf16.msra.mxu0 %v2240_v57 }
 0xdfe   :  { %v1324_v14 = vpop.f32.mrf.mxu0 }
 0xe35   :  { %v1343_v36 = vpop.f32.mrf.mxu1 }
 0xe3d   :  { %v1345_v26 = vpop.f32.mrf.mxu1 }
 0xe4b   :  { %v1364_v5 = vpop.f32.mrf.mxu2 }
 0xe4c   :  { %v1826_v37 = vpack.i.bf16 %v1364_v5, %v1343_v36 }
 0xe4e   :  { %1827 = vrot.lane.b32.xlu1 %v1826_v37, %s2006_s1 }
 0xe53   :  { %v1366_v30 = vpop.f32.mrf.mxu2 }
 0xe5b   :  { %v1448_v38 = vpop.f32.mrf.mxu2 }
 0xe63   :  { %v1450_v39 = vpop.f32.mrf.mxu2 }
 0xe6c   :  { %v1385_v21 = vpop.f32.mrf.mxu3 }
 0xe6e   :  { %v1427_v19 = vpop.f32.mrf.mxu1 }
 0xe6f   :  { %v1836_v27 = vpack.i.bf16 %v1448_v38, %v1427_v19  ;;  %v1406_v1 = vpop.f32.mrf.mxu0 }
 0xe70   :  { %v1831_v35 = vpack.i.bf16 %v1406_v1, %v1385_v21 }
 0xe71   :  { %1837 = vrot.lane.b32.xlu0 %v1836_v27, %s2015_s5 }
 0xe72   :  { %1832 = vrot.lane.b32.xlu2 %v1831_v35, %s2016_s6 }
 0xe74   :  { %v1387_v57 = vpop.f32.mrf.mxu3 }
 0xe76   :  { %v1429_v40 = vpop.f32.mrf.mxu1 }
 0xe77   :  { %v1408_v42 = vpop.f32.mrf.mxu0 }
 0xec0   :  { %v1828_v45 = vpop.permute.xlu1 %1827 }
 0xec1   :  { %v1830_v12 = vunpack.i.h.bf16 %v1828_v45  ;;  %v1829_v33 = vunpack.i.l.bf16 %v1828_v45 }
 0xec3   :  { %v1477_v49 = vsel %vm271_vm11, %v1322_v13, %v1830_v12  ;;  %v1476_v9 = vsel %vm271_vm11, %v2408_v58, %v1829_v33 }
 0xecc   :  { %v1833_v22 = vpop.permute.xlu2 %1832 }
 0xecd   :  { %v1835_v23 = vunpack.i.h.bf16 %v1833_v22  ;;  %v1834_v46 = vunpack.i.l.bf16 %v1833_v22 }
 0xecf   :  { %v1478_v53 = vsel %vm109_vm0, %v1476_v9, %v1834_v46  ;;  %v1479_v44 = vsel %vm109_vm0, %v1477_v49, %v1835_v23 }
 0xee3   :  { %v1838_v48 = vpop.permute.xlu0 %1837 }
 0xee4   :  { %v1840_v10 = vunpack.i.h.bf16 %v1838_v48  ;;  %v1839_v52 = vunpack.i.l.bf16 %v1838_v48 }
 0xee6   :  { %v1480_v54 = vsel %vm745_vm13, %v1478_v53, %v1839_v52  ;;  %v1481_v20 = vsel %vm745_vm13, %v1479_v44, %v1840_v10 }
 0xee7   :  { %v1482_v56 = vpack.c.bf16 %v1481_v20, %v1480_v54 }
 0xee9   :  { %1770 = vmatmul.msk.bf16.vlgmr.msrb.gmra.mxu3 %vm233_vm10, %v1482_v56 }
 0xf6c   :  { %v1495_v3 = vpop.f32.mrf.mxu3 }
 0xf6d   :  { %v1496_v59 = vadd.f32 %v2222_v32, %v1495_v3 }
 0xf6f   :  { %v1500_v60 = vadd.f32 %v1496_v59, %v2289_v50 }
 0xf71   :  { %v1502_v58 = vsel %vm233_vm10, %v1500_v60, 0.0 }
 0xf72   :  { %1503 = vadd.xlane.f32.xlu1 %v1502_v58 }
 0xf74   :  { %v1497_v0 = vpop.f32.mrf.mxu3 }
 0xf75   :  { %v1498_v11 = vadd.f32 %v2222_v32, %v1497_v0 }
 0xf77   :  { %v1501_v2 = vadd.f32 %v1498_v11, %v2292_v51 }
 0xf79   :  { %v1505_v6 = vsel %vm233_vm10, %v1501_v2, 0.0 }
 0xf7a   :  { %1506 = vadd.xlane.f32.xlu2 %v1505_v6 }
 0xfe5   :  { %v1504_v61 = vpop.xlane.xlu1 %1503 }
 0xfe6   :  { %v1508_v7 = vmul.f32 %v1504_v61, %v2230_v8 }
 0xfe8   :  { %v1510_v4 = vsub.f32 %v1500_v60, %v1508_v7 }
 0xfea   :  { %v1512_v16 = vmul.f32 %v1510_v4, %v1510_v4 }
 0xfec   :  { %v1514_v63 = vsel %vm233_vm10, %v1512_v16, 0.0 }
 0xfed   :  { %v1507_v25 = vpop.xlane.xlu2 %1506  ;;  %1515 = vadd.xlane.f32.xlu0 %v1514_v63 }
 0xfee   :  { %v1509_v50 = vmul.f32 %v1507_v25, %v2230_v8 }
 0xff0   :  { %v1511_v28 = vsub.f32 %v1501_v2, %v1509_v50 }
 0xff2   :  { %v1513_v29 = vmul.f32 %v1511_v28, %v1511_v28 }
 0xff4   :  { %v1517_v32 = vsel %vm233_vm10, %v1513_v29, 0.0 }
 0xff5   :  { %1518 = vadd.xlane.f32.xlu1 %v1517_v32 }
0x1060   :  { %v1516_v51 = vpop.xlane.xlu0 %1515 }
0x1061   :  { %v1520_v62 = vmul.f32 %v1516_v51, %v2230_v8 }
0x1063   :  { %v1522_v17 = vadd.f32 1e-12, %v1520_v62 }
0x1065   :  { %1937 = vrsqrt.f32 %v1522_v17  ;;  %vm1530_vm11 = vweird.f32 %v1522_v17 }
0x1068   :  { %v1519_v41 = vpop.xlane.xlu1 %1518 }
0x1069   :  { %v1521_v34 = vmul.f32 %v1519_v41, %v2230_v8 }
0x106b   :  { %v1938_v24 = vpop.eup %1937  ;;  %v1523_v13 = vadd.f32 1e-12, %v1521_v34 }
0x106c   :  { %v1525_v14 = vmul.f32 %v1938_v24, %v1522_v17  ;;  %vm1531_vm0 = vweird.f32 %v1938_v24 }
0x106d   :  { %1939 = vrsqrt.f32 %v1523_v13  ;;  %vm1532_vm12 = vmor %vm1530_vm11, %vm1531_vm0  ;;  %vm1540_vm2 = vweird.f32 %v1523_v13 }
0x106e   :  { %v1526_v36 = vmul.f32 %v1938_v24, %v1525_v14 }
0x1070   :  { %v1527_v26 = vmul.f32 0.5, %v1526_v36 }
0x1072   :  { %v1528_v5 = vsub.f32 1.5, %v1527_v26 }
0x1073   :  { %v1940_v37 = vpop.eup %1939 }
0x1074   :  { %v1529_v30 = vmul.f32 %v1938_v24, %v1528_v5  ;;  %v1535_v38 = vmul.f32 %v1940_v37, %v1523_v13  ;;  %vm1541_vm13 = vweird.f32 %v1940_v37 }
0x1075   :  { %vm1542_vm3 = vmor %vm1540_vm2, %vm1541_vm13 }
0x1076   :  { %v1536_v39 = vmul.f32 %v1940_v37, %v1535_v38  ;;  %v1533_v21 = vsel %vm1532_vm12, %v1938_v24, %v1529_v30 }
0x1077   :  { %v1544_v1 = vmul.f32 %v1533_v21, %v1510_v4 }
0x1078   :  { %v1537_v19 = vmul.f32 0.5, %v1536_v39 }
0x1079   :  { %v1546_v40 = vmul.f32 %v2244_v15, %v1544_v1 }
0x107a   :  { %v1538_v27 = vsub.f32 1.5, %v1537_v19 }
0x107b   :  { %v1548_v22 = vadd.f32 %v2246_v18, %v1546_v40 }
0x107c   :  { %v1539_v35 = vmul.f32 %v1940_v37, %v1538_v27 }
0x107e   :  { %v1543_v57 = vsel %vm1542_vm3, %v1940_v37, %v1539_v35  ;;  %v1791_v37 = vld [vmem:[#allocation2 + $0x48] sm:$0xff] }
0x107f   :  { %v1545_v42 = vmul.f32 %v1543_v57, %v1511_v28 }
0x1081   :  { %v1547_v45 = vmul.f32 %v2244_v15, %v1545_v42 }
0x1083   :  { %v1549_v12 = vadd.f32 %v2246_v18, %v1547_v45 }
0x1085   :  { %v1550_v33 = vpack.c.bf16 %v1549_v12, %v1548_v22 }
0x1087   :  { %1771 = vmatmul.msk.bf16.vlgmr.msra.gmra.mxu0 %vm233_vm10, %v1550_v33 }
0x1104   :  { %v1563_v23 = vpop.f32.mrf.mxu0 }
0x1105   :  { %v1564_v46 = vadd.f32 %v2261_v31, %v1563_v23 }
0x1107   :  { %v1568_v48 = vmul.f32 %v1564_v46, %v1564_v46 }
0x1109   :  { %v1570_v49 = vmul.f32 %v1568_v48, %v1564_v46 }
0x110b   :  { %v1572_v9 = vmul.f32 0.044715, %v1570_v49 }
0x110c   :  { %v1565_v10 = vpop.f32.mrf.mxu0 }
0x110d   :  { %v1574_v52 = vadd.f32 %v1572_v9, %v1564_v46  ;;  %v1566_v53 = vadd.f32 %v2261_v31, %v1565_v10 }
0x110f   :  { %v1576_v44 = vmul.f32 0.7978846, %v1574_v52  ;;  %v1569_v54 = vmul.f32 %v1566_v53, %v1566_v53 }
0x1111   :  { %v1571_v15 = vmul.f32 %v1569_v54, %v1566_v53  ;;  %1941 = vtanh.f32 %v1576_v44  ;;  %v1852_v44 = vld [vmem:[#allocation4 + $0xb] ss:$0 sm:$0xff] }
0x1113   :  { %v1573_v20 = vmul.f32 0.044715, %v1571_v15 }
0x1115   :  { %v1575_v56 = vadd.f32 %v1573_v20, %v1566_v53 }
0x1117   :  { %v1577_v18 = vmul.f32 0.7978846, %v1575_v56  ;;  %v1942_v3 = vpop.eup %1941 }
0x1118   :  { %v1580_v59 = vadd.f32 1.0, %v1942_v3 }
0x1119   :  { %1943 = vtanh.f32 %v1577_v18 }
0x111a   :  { %v1582_v58 = vmul.f32 0.5, %v1580_v59 }
0x111c   :  { %v1584_v2 = vmul.f32 %v1582_v58, %v1564_v46 }
0x111f   :  { %v1944_v60 = vpop.eup %1943 }
0x1120   :  { %v1581_v0 = vadd.f32 1.0, %v1944_v60 }
0x1122   :  { %v1583_v11 = vmul.f32 0.5, %v1581_v0 }
0x1124   :  { %v1585_v6 = vmul.f32 %v1583_v11, %v1566_v53 }
0x1126   :  { %v1586_v61 = vpack.c.bf16 %v1585_v6, %v1584_v2 }
0x1128   :  { %1772 = vmatmul.msk.bf16.vlgmr.msra.gmra.mxu1 %vm902_vm6, %v1586_v61 }
0x11a5   :  { %v1599_v31 = vpop.f32.mrf.mxu1 }
0x11a6   :  { %v1600_v7 = vadd.f32 %v2270_v55, %v1599_v31 }
0x11a8   :  { %v1604_v4 = vadd.f32 %v1600_v7, %v1548_v22 }
0x11aa   :  { %v1606_v16 = vsel %vm233_vm10, %v1604_v4, 0.0 }
0x11ab   :  { %1607 = vadd.xlane.f32.xlu2 %v1606_v16 }
0x11ad   :  { %v1601_v63 = vpop.f32.mrf.mxu1 }
0x11ae   :  { %v1602_v25 = vadd.f32 %v2270_v55, %v1601_v63  ;;  %v1792_v55 = vld [vmem:[#allocation2 + $0x50] sm:$0xff] }
0x11af   :  { %1676 = vmatpush.bf16.msra.mxu2 %v1792_v55 }
0x11b0   :  { %v1605_v50 = vadd.f32 %v1602_v25, %v1549_v12 }
0x11b2   :  { %v1609_v28 = vsel %vm233_vm10, %v1605_v50, 0.0 }
0x11b3   :  { %1610 = vadd.xlane.f32.xlu0 %v1609_v28  ;;  %1677 = vmatpush.bf16.msra.mxu2 %v1791_v37 }
0x121e   :  { %v1608_v29 = vpop.xlane.xlu2 %1607 }
0x121f   :  { %v1612_v32 = vmul.f32 %v1608_v29, %v2230_v8 }
0x1221   :  { %v1614_v51 = vsub.f32 %v1604_v4, %v1612_v32 }
0x1223   :  { %v1616_v62 = vmul.f32 %v1614_v51, %v1614_v51 }
0x1225   :  { %v1618_v17 = vsel %vm233_vm10, %v1616_v62, 0.0 }
0x1226   :  { %v1611_v41 = vpop.xlane.xlu0 %1610  ;;  %1619 = vadd.xlane.f32.xlu1 %v1618_v17 }
0x1227   :  { %v1613_v34 = vmul.f32 %v1611_v41, %v2230_v8 }
0x1229   :  { %v1615_v24 = vsub.f32 %v1605_v50, %v1613_v34 }
0x122b   :  { %v1617_v13 = vmul.f32 %v1615_v24, %v1615_v24 }
0x122d   :  { %v1621_v14 = vsel %vm233_vm10, %v1617_v13, 0.0 }
0x122e   :  { %1622 = vadd.xlane.f32.xlu2 %v1621_v14 }
0x1299   :  { %v1620_v36 = vpop.xlane.xlu1 %1619 }
0x129a   :  { %v1624_v26 = vmul.f32 %v1620_v36, %v2230_v8 }
0x129c   :  { %v1626_v5 = vadd.f32 1e-12, %v1624_v26 }
0x129e   :  { %1945 = vrsqrt.f32 %v1626_v5  ;;  %vm1634_vm5 = vweird.f32 %v1626_v5 }
0x12a1   :  { %v1623_v30 = vpop.xlane.xlu2 %1622 }
0x12a2   :  { %v1625_v38 = vmul.f32 %v1623_v30, %v2230_v8 }
0x12a4   :  { %v1946_v39 = vpop.eup %1945  ;;  %v1627_v21 = vadd.f32 1e-12, %v1625_v38 }
0x12a5   :  { %v1629_v19 = vmul.f32 %v1946_v39, %v1626_v5  ;;  %vm1635_vm4 = vweird.f32 %v1946_v39 }
0x12a6   :  { %1947 = vrsqrt.f32 %v1627_v21  ;;  %vm1636_vm6 = vmor %vm1634_vm5, %vm1635_vm4  ;;  %vm1644_vm8 = vweird.f32 %v1627_v21 }
0x12a7   :  { %v1630_v27 = vmul.f32 %v1946_v39, %v1629_v19 }
0x12a9   :  { %v1631_v1 = vmul.f32 0.5, %v1630_v27 }
0x12ab   :  { %v1632_v35 = vsub.f32 1.5, %v1631_v1 }
0x12ac   :  { %v1948_v57 = vpop.eup %1947 }
0x12ad   :  { %v1633_v40 = vmul.f32 %v1946_v39, %v1632_v35  ;;  %v1639_v42 = vmul.f32 %v1948_v57, %v1627_v21  ;;  %vm1645_vm7 = vweird.f32 %v1948_v57 }
0x12ae   :  { %vm1646_vm9 = vmor %vm1644_vm8, %vm1645_vm7 }
0x12af   :  { %v1640_v45 = vmul.f32 %v1948_v57, %v1639_v42  ;;  %v1637_v22 = vsel %vm1636_vm6, %v1946_v39, %v1633_v40 }
0x12b0   :  { %v1648_v23 = vmul.f32 %v1637_v22, %v1614_v51 }
0x12b1   :  { %v1641_v12 = vmul.f32 0.5, %v1640_v45 }
0x12b2   :  { %v1650_v48 = vmul.f32 %v2282_v43, %v1648_v23 }
0x12b3   :  { %v1642_v33 = vsub.f32 1.5, %v1641_v12 }
0x12b4   :  { %v1652_v10 = vadd.f32 %v2284_v47, %v1650_v48 }
0x12b5   :  { %v1643_v8 = vmul.f32 %v1948_v57, %v1642_v33 }
0x12b7   :  { %v1647_v46 = vsel %vm1646_vm9, %v1948_v57, %v1643_v8 }
0x12b8   :  { %v1649_v49 = vmul.f32 %v1647_v46, %v1615_v24 }
0x12ba   :  { %v1651_v9 = vmul.f32 %v2282_v43, %v1649_v49 }
0x12bc   :  { %v1653_v52 = vadd.f32 %v2284_v47, %v1651_v9 }
0x12be   :  { %v1654_v53 = vpack.c.bf16 %v1653_v52, %v1652_v10 }
0x12c0   :  { %1781 = vmatmul.msk.bf16.vlgmr.msra.gmra.mxu2 %vm233_vm10, %v1654_v53 }
0x1343   :  { %v1679_v54 = vpop.f32.mrf.mxu2 }
0x1344   :  { %v1680_v15 = vadd.f32 %v1852_v44, %v1679_v54 }
0x1346   :  { %1684 = vst [vmem:[%s2490_s3] sm:$0xff] %v1680_v15 }
0x1347   :  { %1686 = vst.msk [vmem:[%s2490_s3] sm:$0xff] %vm233_vm10, %v1652_v10 }
0x134b   :  { %v1681_v43 = vpop.f32.mrf.mxu2 }
0x134c   :  { %v1682_v20 = vadd.f32 %v1852_v44, %v1681_v43 }
0x134e   :  { %1685 = vst [vmem:[%s2490_s3 + $0x8] sm:$0xff] %v1682_v20 }
0x134f   :  { %1687 = vst.msk [vmem:[%s2490_s3 + $0x8] sm:$0xff] %vm233_vm10, %v1653_v52 }
0x1350   :  { %1692 = vsyncpa [#allocation3], 1 }
0x1351   :  { %1693 = vsyncpa [#allocation5], 1 }

</bundles_post_ra>
